<compile_context>
chip_gen: v7x
topology: tpu7x:2x2x1
jax: 0.10.0
libtpu: 0.0.40
codegen_flags: <defaults>
</compile_context>

<pallas_src>
import functools

import jax
import jax.numpy as jnp
import numpy as np
from jax.experimental import pallas as pl
from jax.experimental.pallas import tpu as pltpu

NEG_SLOPE = 0.01  # PyTorch nn.LeakyReLU default negative_slope

# Original (PyTorch-style, already-transposed) parameter names — used by init/reference.
PARAM_ORDER = (
    "e1w1", "e1b1", "e1w2", "e1b2",          # encoder
    "e2w1", "e2b1", "e2w2", "e2b2",          # encoder2
    "wv", "bv", "wo", "bo",                  # MultiheadAttention (v-proj + out-proj)
    "eow1", "eob1", "eow2", "eob2",          # encoder_out
    "sdw1", "sdb1", "sdw2", "sdb2",          # shallowdecoder
    "ddw1", "ddb1", "ddw2", "ddb2", "ddw3", "ddb3",  # deepdecoder
    "rw1", "rb1", "rw2", "rb2",              # regressor
)

# Fused / padded parameter order actually fed to the kernel.
FUSED_ORDER = (
    "w12", "b12",                            # e1w1 || e2w1 packed first layers
    "e1w2", "e1b2",                          # encoder layer 2 -> enc slab cols [0:lh]
    "e2w2", "e2b2",                          # encoder2 layer 2 (K padded to h12 width)
    "wf", "bf",                              # folded wv@wo@eow1 (+ bias chain)
    "eow2", "eob2",                          # encoder_out layer 2 -> enc slab cols [lh:2lh]
    "sdw1", "sdb1", "sdw2", "sdb2",          # shallowdecoder (K / N padded)
    "ddw1", "ddb1", "ddw2", "ddb2", "ddw3", "ddb3",  # deepdecoder (K / N padded)
    "rw1", "rb1", "rw2", "rb2",              # regressor (K padded; head N padded to 128)
)


def _round_up(a, m):
    return ((a + m - 1) // m) * m


def _leaky(x):
    return jnp.where(x > 0, x, NEG_SLOPE * x)


def _place(a, shape, r0=0, c0=0):
    """Embed 2-D `a` into a zero matrix of `shape` at row/col offset (r0, c0)."""
    z = jnp.zeros(shape, a.dtype)
    return z.at[r0:r0 + a.shape[0], c0:c0 + a.shape[1]].set(a)


def _ae_kernel(x_ref,
               w12, b12, e1w2, e1b2, e2w2, e2b2, wf, bf, eow2, eob2,
               sdw1, sdb1, sdw2, sdb2,
               ddw1, ddb1, ddw2, ddb2, ddw3, ddb3,
               rw1, rb1, rw2, rb2,
               enc_ref, dec1_ref, dec2_ref, pred_ref,
               *, compute_dtype):

    def lin(h, w, b):
        # MXU matmul with f32 accumulation; activations stay f32 ("master" copy),
        # cast to compute_dtype (bf16 by default) only at the dot input.
        return jnp.dot(h.astype(compute_dtype), w[...],
                       preferred_element_type=jnp.float32) + b[...]

    x = x_ref[...]

    # Packed first layers of encoder / encoder2 (shared input x), lane-dense width.
    h12 = _leaky(lin(x, w12, b12))

    # encoder branch -> enc1 slab (live cols [0:lh], zero elsewhere: padded weight
    # cols + padded bias cols are zero and LeakyReLU(0) == 0).
    enc1 = _leaky(lin(h12, e1w2, e1b2))

    # encoder2 -> folded (seq_len==1) attention + encoder_out layer 1 -> enc2 slab
    # (live cols [lh:2lh]).
    h2 = _leaky(lin(h12, e2w2, e2b2))
    h3 = _leaky(lin(h2, wf, bf))
    enc2 = _leaky(lin(h3, eow2, eob2))

    # encoded = [enc1 | enc2]: the slabs are lane-disjoint, so one add + one
    # full-width unmasked store.
    enc = enc1 + enc2
    enc_ref[...] = enc

    # shallow decoder (no activation after the final linear); output N padded.
    d1 = _leaky(lin(enc1, sdw1, sdb1))
    dec1_ref[...] = lin(d1, sdw2, sdb2)

    # deep decoder (no activation after the final linear); output N padded.
    d2 = _leaky(lin(enc2, ddw1, ddb1))
    d2 = _leaky(lin(d2, ddw2, ddb2))
    dec2_ref[...] = lin(d2, ddw3, ddb3)

    # regressor head on the full enc slab (LeakyReLU then ReLU); rw2/rb2 are padded
    # to 128 output lanes (useful value in column 0) so the store is unmasked.
    r = _leaky(lin(enc, rw1, rb1))
    pred_ref[...] = jnp.maximum(lin(r, rw2, rb2), 0.0)


def fuse_params(p, *, compute_dtype=jnp.float32):
    """Host-side algebraic folding, horizontal packing and lane/K zero-padding."""
    input_dim = p["e1w1"].shape[0]
    half = p["e1w1"].shape[1]        # input_dim // 2
    lh = p["e1w2"].shape[1]          # latent_dim // 2
    hidden = p["e2w2"].shape[1]
    q8 = p["eow1"].shape[1]          # input_dim // 8
    q4 = p["ddw1"].shape[1]          # input_dim // 4

    h12_w = _round_up(2 * half, 128)     # lane-dense width of the packed layer-1 output
    enc_w = _round_up(2 * lh, 128)       # lane-dense "enc slab" width
    dec_w = _round_up(input_dim, 128)
    pred_w = 128

    # MHA with seq_len == 1 is exactly out_proj(v_proj(x)); fold with encoder_out L1.
    wf = p["wv"] @ p["wo"] @ p["eow1"]
    bf = p["bv"] @ p["wo"] @ p["eow1"] + p["bo"] @ p["eow1"] + p["eob1"]

    wd = compute_dtype  # matmul-input dtype for weights; biases stay f32
    fused = {
        # packed encoder/encoder2 first layers, output lane-padded to h12_w
        "w12":  _place(jnp.concatenate([p["e1w1"], p["e2w1"]], axis=1),
                       (input_dim, h12_w)).astype(wd),
        "b12":  _place(jnp.concatenate([p["e1b1"], p["e2b1"]], axis=1), (1, h12_w)),
        # encoder layer 2: live K rows [0:half] of h12, live N cols [0:lh] of enc slab
        "e1w2": _place(p["e1w2"], (h12_w, enc_w), 0, 0).astype(wd),
        "e1b2": _place(p["e1b2"], (1, enc_w), 0, 0),
        # encoder2 layer 2: live K rows [half:2*half] of h12
        "e2w2": _place(p["e2w2"], (h12_w, hidden), half, 0).astype(wd),
        "e2b2": p["e2b2"],
        "wf":   wf.astype(wd),
        "bf":   bf,
        # encoder_out layer 2: live N cols [lh:2lh] of enc slab
        "eow2": _place(p["eow2"], (q8, enc_w), 0, lh).astype(wd),
        "eob2": _place(p["eob2"], (1, enc_w), 0, lh),
        # shallow decoder: consumes enc slab cols [0:lh]; final N lane-padded
        "sdw1": _place(p["sdw1"], (enc_w, hidden), 0, 0).astype(wd),
        "sdb1": p["sdb1"],
        "sdw2": _place(p["sdw2"], (hidden, dec_w)).astype(wd),
        "sdb2": _place(p["sdb2"], (1, dec_w)),
        # deep decoder: consumes enc slab cols [lh:2lh]; final N lane-padded
        "ddw1": _place(p["ddw1"], (enc_w, q4), lh, 0).astype(wd),
        "ddb1": p["ddb1"],
        "ddw2": p["ddw2"].astype(wd),
        "ddb2": p["ddb2"],
        "ddw3": _place(p["ddw3"], (half, dec_w)).astype(wd),
        "ddb3": _place(p["ddb3"], (1, dec_w)),
        # regressor: consumes the full enc slab; head lane-padded to 128
        "rw1":  _place(p["rw1"], (enc_w, lh), 0, 0).astype(wd),
        "rb1":  p["rb1"],
        "rw2":  _place(p["rw2"], (lh, pred_w)).astype(wd),
        "rb2":  _place(p["rb2"], (1, pred_w)),
    }
    return fused, (h12_w, enc_w, dec_w, pred_w)


def _choose_batch_tile(B):
    """Pick the batch tile: big tiles amortize per-step (~0.35us) and MXU
    fill/drain overhead, but keep >= 2 grid steps once B > 16 (v7x dual-TC
    sharding of the 'parallel' axis) and <= ~12.5% zero-padding waste."""
    B8 = _round_up(B, 8)
    if B8 <= 16:
        return B8
    for tile in (512, 256, 128, 64, 32, 16, 8):
        if tile > B8 // 2:
            continue                              # keep at least 2 grid steps
        if (_round_up(B, tile) - B) * 8 <= B:      # padding waste <= 12.5%
            return tile
    return 8


def attention_ae_midconcat(x, params, *, batch_tile=None, compute_dtype=jnp.bfloat16):
    B, input_dim = x.shape
    lh = params["e1w2"].shape[1]
    latent_dim = 2 * lh

    fused, (h12_w, enc_w, dec_w, pred_w) = fuse_params(params, compute_dtype=compute_dtype)
    param_list = [fused[name] for name in FUSED_ORDER]

    # ---- batch tiling ----
    if batch_tile is None:
        batch_tile = _choose_batch_tile(B)
    batch_tile = max(8, _round_up(int(batch_tile), 8))   # (8,128) rule on dim 0
    batch_tile = min(batch_tile, _round_up(B, 8))
    B_pad = _round_up(B, batch_tile)
    if B_pad != B:
        x = jnp.pad(x, ((0, B_pad - B), (0, 0)))
    grid = (B_pad // batch_tile,)

    # ---- block specs ----
    in_specs = [pl.BlockSpec((batch_tile, input_dim), lambda i: (i, 0))]
    for p in param_list:
        # Grid-invariant parameters: one full-array block (constant index_map, so
        # the pipeline fetches them once and keeps them VMEM-resident).
        in_specs.append(pl.BlockSpec(p.shape, lambda i: (0, 0)))

    out_shapes = (
        jax.ShapeDtypeStruct((B_pad, enc_w), jnp.float32),
        jax.ShapeDtypeStruct((B_pad, dec_w), jnp.float32),
        jax.ShapeDtypeStruct((B_pad, dec_w), jnp.float32),
        jax.ShapeDtypeStruct((B_pad, pred_w), jnp.float32),
    )
    out_specs = [
        pl.BlockSpec((batch_tile, enc_w), lambda i: (i, 0)),
        pl.BlockSpec((batch_tile, dec_w), lambda i: (i, 0)),
        pl.BlockSpec((batch_tile, dec_w), lambda i: (i, 0)),
        pl.BlockSpec((batch_tile, pred_w), lambda i: (i, 0)),
    ]

    # ---- scoped-VMEM budget (weights are still double-buffered by the pipeline) ----
    w_bytes = sum(int(np.prod(p.shape)) * p.dtype.itemsize for p in param_list)
    io_bytes = 4 * batch_tile * (input_dim + enc_w + 2 * dec_w + pred_w)
    vmem_need = 2 * (w_bytes + io_bytes) + (8 << 20)            # 2x buffering + headroom
    vmem_limit = int(max(32 << 20, min(vmem_need, 64 << 20)))   # clamp to v7x physical
    # NOTE: pipeline_mode=pl.Buffered(1) on the constant weight specs would halve the
    # weight VMEM footprint on v7x; omitted here for portability across jax versions.

    kernel = functools.partial(_ae_kernel, compute_dtype=compute_dtype)
    enc_p, dec1_p, dec2_p, pred_p = pl.pallas_call(
        kernel,
        out_shape=out_shapes,
        grid_spec=pltpu.PrefetchScalarGridSpec(
            num_scalar_prefetch=0,
            grid=grid,
            in_specs=in_specs,
            out_specs=out_specs,
        ),
        compiler_params=pltpu.CompilerParams(
            dimension_semantics=("parallel",),
            vmem_limit_bytes=vmem_limit),
    )(x, *param_list)

    return (enc_p[:B, :latent_dim],
            dec1_p[:B, :input_dim],
            dec2_p[:B, :input_dim],
            pred_p[:B, :1])


def init_params(key, input_dim, latent_dim, hidden_dim):
    shapes = {
        "e1w1": (input_dim, input_dim // 2),       "e1b1": (1, input_dim // 2),
        "e1w2": (input_dim // 2, latent_dim // 2), "e1b2": (1, latent_dim // 2),
        "e2w1": (input_dim, input_dim // 2),       "e2b1": (1, input_dim // 2),
        "e2w2": (input_dim // 2, hidden_dim),      "e2b2": (1, hidden_dim),
        "wv":   (hidden_dim, hidden_dim),          "bv":   (1, hidden_dim),
        "wo":   (hidden_dim, hidden_dim),          "bo":   (1, hidden_dim),
        "eow1": (hidden_dim, input_dim // 8),      "eob1": (1, input_dim // 8),
        "eow2": (input_dim // 8, latent_dim // 2), "eob2": (1, latent_dim // 2),
        "sdw1": (latent_dim // 2, hidden_dim),     "sdb1": (1, hidden_dim),
        "sdw2": (hidden_dim, input_dim),           "sdb2": (1, input_dim),
        "ddw1": (latent_dim // 2, input_dim // 4), "ddb1": (1, input_dim // 4),
        "ddw2": (input_dim // 4, input_dim // 2),  "ddb2": (1, input_dim // 2),
        "ddw3": (input_dim // 2, input_dim),       "ddb3": (1, input_dim),
        "rw1":  (latent_dim, latent_dim // 2),     "rb1":  (1, latent_dim // 2),
        "rw2":  (latent_dim // 2, 1),              "rb2":  (1, 1),
    }
    assert tuple(shapes.keys()) == PARAM_ORDER
    params = {}
    for i, (name, shp) in enumerate(shapes.items()):
        params[name] = 0.1 * jax.random.normal(
            jax.random.fold_in(key, i), shp, jnp.float32)
    return params


def reference(x, p):
    """Pure-JAX reference of the PyTorch forward pass (unfused, for correctness)."""
    lin = lambda h, w, b: h @ w + b
    leaky = lambda v: jnp.where(v > 0, v, NEG_SLOPE * v)
    e1 = leaky(lin(leaky(lin(x, p["e1w1"], p["e1b1"])), p["e1w2"], p["e1b2"]))
    h = leaky(lin(leaky(lin(x, p["e2w1"], p["e2b1"])), p["e2w2"], p["e2b2"]))
    attn = lin(lin(h, p["wv"], p["bv"]), p["wo"], p["bo"])
    e2 = leaky(lin(leaky(lin(attn, p["eow1"], p["eob1"])), p["eow2"], p["eob2"]))
    enc = jnp.concatenate([e1, e2], axis=1)
    d1 = lin(leaky(lin(e1, p["sdw1"], p["sdb1"])), p["sdw2"], p["sdb2"])
    d2 = leaky(lin(e2, p["ddw1"], p["ddb1"]))
    d2 = leaky(lin(d2, p["ddw2"], p["ddb2"]))
    d2 = lin(d2, p["ddw3"], p["ddb3"])
    pred = jnp.maximum(
        lin(leaky(lin(enc, p["rw1"], p["rb1"])), p["rw2"], p["rb2"]), 0.0)
    return enc, d1, d2, pred


if __name__ == "__main__":
    B = 16
    input_dim, latent_dim, hidden_dim, num_heads = 128, 32, 64, 4
    assert hidden_dim % num_heads == 0  # MHA constraint (heads are a no-op with seq=1)

    key = jax.random.PRNGKey(0)
    x = jax.random.normal(jax.random.fold_in(key, 100), (B, input_dim), jnp.float32)
    params = init_params(jax.random.fold_in(key, 200), input_dim, latent_dim, hidden_dim)

    refs = reference(x, params)

    # f32 compute path: strict numerical check of the fused / folded / padded kernel.
    outs_f32 = jax.block_until_ready(
        attention_ae_midconcat(x, params, compute_dtype=jnp.float32))
    for got, want in zip(outs_f32, refs):
        np.testing.assert_allclose(np.asarray(got), np.asarray(want),
                                   rtol=1e-4, atol=1e-4)

    # Default bf16 weights / matmul inputs with f32 accumulation (MXU-friendly);
    # bf16 rounding through the layer chain warrants a looser tolerance.
    outs_bf16 = jax.block_until_ready(attention_ae_midconcat(x, params))
    for got, want in zip(outs_bf16, refs):
        np.testing.assert_allclose(np.asarray(got), np.asarray(want),
                                   rtol=5e-2, atol=5e-2)

    print("KERNEL_OK")
</pallas_src>

<mosaic_0001>
module attributes {stable_mosaic.version = 11 : i64} {
  func.func @_ae_kernel(%arg0: i32, %arg1: memref<16x128xf32, #tpu.memory_space<vmem>>, %arg2: memref<128x128xf32, #tpu.memory_space<vmem>>, %arg3: memref<1x128xf32, #tpu.memory_space<vmem>>, %arg4: memref<128x128xf32, #tpu.memory_space<vmem>>, %arg5: memref<1x128xf32, #tpu.memory_space<vmem>>, %arg6: memref<128x64xf32, #tpu.memory_space<vmem>>, %arg7: memref<1x64xf32, #tpu.memory_space<vmem>>, %arg8: memref<64x16xf32, #tpu.memory_space<vmem>>, %arg9: memref<1x16xf32, #tpu.memory_space<vmem>>, %arg10: memref<16x128xf32, #tpu.memory_space<vmem>>, %arg11: memref<1x128xf32, #tpu.memory_space<vmem>>, %arg12: memref<128x64xf32, #tpu.memory_space<vmem>>, %arg13: memref<1x64xf32, #tpu.memory_space<vmem>>, %arg14: memref<64x128xf32, #tpu.memory_space<vmem>>, %arg15: memref<1x128xf32, #tpu.memory_space<vmem>>, %arg16: memref<128x32xf32, #tpu.memory_space<vmem>>, %arg17: memref<1x32xf32, #tpu.memory_space<vmem>>, %arg18: memref<32x64xf32, #tpu.memory_space<vmem>>, %arg19: memref<1x64xf32, #tpu.memory_space<vmem>>, %arg20: memref<64x128xf32, #tpu.memory_space<vmem>>, %arg21: memref<1x128xf32, #tpu.memory_space<vmem>>, %arg22: memref<128x16xf32, #tpu.memory_space<vmem>>, %arg23: memref<1x16xf32, #tpu.memory_space<vmem>>, %arg24: memref<16x128xf32, #tpu.memory_space<vmem>>, %arg25: memref<1x128xf32, #tpu.memory_space<vmem>>, %arg26: memref<16x128xf32, #tpu.memory_space<vmem>>, %arg27: memref<16x128xf32, #tpu.memory_space<vmem>>, %arg28: memref<16x128xf32, #tpu.memory_space<vmem>>, %arg29: memref<16x128xf32, #tpu.memory_space<vmem>>) attributes {dimension_semantics = [#tpu.dimension_semantics<parallel>], iteration_bounds = array<i64: 1>, scalar_prefetch = 0 : i64, scratch_operands = 0 : i64, tpu.core_type = #tpu.core_type<tc>, window_params = [{transform_indices = @transform_0, window_bounds = array<i64: 16, 128>}, {pipeline_mode = #tpu.pipeline_mode<synchronous>, transform_indices = @transform_1, window_bounds = array<i64: 128, 128>}, {pipeline_mode = #tpu.pipeline_mode<synchronous>, transform_indices = @transform_2, window_bounds = array<i64: 1, 128>}, {pipeline_mode = #tpu.pipeline_mode<synchronous>, transform_indices = @transform_3, window_bounds = array<i64: 128, 128>}, {pipeline_mode = #tpu.pipeline_mode<synchronous>, transform_indices = @transform_4, window_bounds = array<i64: 1, 128>}, {pipeline_mode = #tpu.pipeline_mode<synchronous>, transform_indices = @transform_5, window_bounds = array<i64: 128, 64>}, {pipeline_mode = #tpu.pipeline_mode<synchronous>, transform_indices = @transform_6, window_bounds = array<i64: 1, 64>}, {pipeline_mode = #tpu.pipeline_mode<synchronous>, transform_indices = @transform_7, window_bounds = array<i64: 64, 16>}, {pipeline_mode = #tpu.pipeline_mode<synchronous>, transform_indices = @transform_8, window_bounds = array<i64: 1, 16>}, {pipeline_mode = #tpu.pipeline_mode<synchronous>, transform_indices = @transform_9, window_bounds = array<i64: 16, 128>}, {pipeline_mode = #tpu.pipeline_mode<synchronous>, transform_indices = @transform_10, window_bounds = array<i64: 1, 128>}, {pipeline_mode = #tpu.pipeline_mode<synchronous>, transform_indices = @transform_11, window_bounds = array<i64: 128, 64>}, {pipeline_mode = #tpu.pipeline_mode<synchronous>, transform_indices = @transform_12, window_bounds = array<i64: 1, 64>}, {pipeline_mode = #tpu.pipeline_mode<synchronous>, transform_indices = @transform_13, window_bounds = array<i64: 64, 128>}, {pipeline_mode = #tpu.pipeline_mode<synchronous>, transform_indices = @transform_14, window_bounds = array<i64: 1, 128>}, {pipeline_mode = #tpu.pipeline_mode<synchronous>, transform_indices = @transform_15, window_bounds = array<i64: 128, 32>}, {pipeline_mode = #tpu.pipeline_mode<synchronous>, transform_indices = @transform_16, window_bounds = array<i64: 1, 32>}, {pipeline_mode = #tpu.pipeline_mode<synchronous>, transform_indices = @transform_17, window_bounds = array<i64: 32, 64>}, {pipeline_mode = #tpu.pipeline_mode<synchronous>, transform_indices = @transform_18, window_bounds = array<i64: 1, 64>}, {pipeline_mode = #tpu.pipeline_mode<synchronous>, transform_indices = @transform_19, window_bounds = array<i64: 64, 128>}, {pipeline_mode = #tpu.pipeline_mode<synchronous>, transform_indices = @transform_20, window_bounds = array<i64: 1, 128>}, {pipeline_mode = #tpu.pipeline_mode<synchronous>, transform_indices = @transform_21, window_bounds = array<i64: 128, 16>}, {pipeline_mode = #tpu.pipeline_mode<synchronous>, transform_indices = @transform_22, window_bounds = array<i64: 1, 16>}, {pipeline_mode = #tpu.pipeline_mode<synchronous>, transform_indices = @transform_23, window_bounds = array<i64: 16, 128>}, {pipeline_mode = #tpu.pipeline_mode<synchronous>, transform_indices = @transform_24, window_bounds = array<i64: 1, 128>}, {transform_indices = @transform_25, window_bounds = array<i64: 16, 128>}, {transform_indices = @transform_26, window_bounds = array<i64: 16, 128>}, {transform_indices = @transform_27, window_bounds = array<i64: 16, 128>}, {transform_indices = @transform_28, window_bounds = array<i64: 16, 128>}]} {
    %c0 = arith.constant 0 : index
    %c0_0 = arith.constant 0 : index
    %0 = vector.load %arg1[%c0, %c0_0] : memref<16x128xf32, #tpu.memory_space<vmem>>, vector<16x128xf32>
    %c0_1 = arith.constant 0 : index
    %c0_2 = arith.constant 0 : index
    %1 = vector.load %arg2[%c0_1, %c0_2] : memref<128x128xf32, #tpu.memory_space<vmem>>, vector<128x128xf32>
    %cst = arith.constant dense<0.000000e+00> : vector<16x128xf32>
    %2 = tpu.matmul %0, %1, %cst {dimension_numbers = #tpu.dot_dimension_numbers<[1], [0], [0], [1], [0, 0, 1, 1], [], []>} : vector<16x128xf32>, vector<128x128xf32>, vector<16x128xf32> -> vector<16x128xf32>
    %c0_3 = arith.constant 0 : index
    %c0_4 = arith.constant 0 : index
    %3 = vector.load %arg3[%c0_3, %c0_4] : memref<1x128xf32, #tpu.memory_space<vmem>>, vector<1x128xf32>
    %4 = vector.broadcast %3 : vector<1x128xf32> to vector<16x128xf32>
    %5 = arith.addf %2, %4 : vector<16x128xf32>
    %cst_5 = arith.constant 0.000000e+00 : f32
    %6 = vector.broadcast %cst_5 : f32 to vector<16x128xf32>
    %7 = arith.cmpf ogt, %5, %6 : vector<16x128xf32>
    %cst_6 = arith.constant 0.00999999977 : f32
    %8 = vector.broadcast %cst_6 : f32 to vector<16x128xf32>
    %9 = arith.mulf %8, %5 : vector<16x128xf32>
    %10 = arith.select %7, %5, %9 : vector<16x128xi1>, vector<16x128xf32>
    %c0_7 = arith.constant 0 : index
    %c0_8 = arith.constant 0 : index
    %11 = vector.load %arg4[%c0_7, %c0_8] : memref<128x128xf32, #tpu.memory_space<vmem>>, vector<128x128xf32>
    %cst_9 = arith.constant dense<0.000000e+00> : vector<16x128xf32>
    %12 = tpu.matmul %10, %11, %cst_9 {dimension_numbers = #tpu.dot_dimension_numbers<[1], [0], [0], [1], [0, 0, 1, 1], [], []>} : vector<16x128xf32>, vector<128x128xf32>, vector<16x128xf32> -> vector<16x128xf32>
    %c0_10 = arith.constant 0 : index
    %c0_11 = arith.constant 0 : index
    %13 = vector.load %arg5[%c0_10, %c0_11] : memref<1x128xf32, #tpu.memory_space<vmem>>, vector<1x128xf32>
    %14 = vector.broadcast %13 : vector<1x128xf32> to vector<16x128xf32>
    %15 = arith.addf %12, %14 : vector<16x128xf32>
    %cst_12 = arith.constant 0.000000e+00 : f32
    %16 = vector.broadcast %cst_12 : f32 to vector<16x128xf32>
    %17 = arith.cmpf ogt, %15, %16 : vector<16x128xf32>
    %cst_13 = arith.constant 0.00999999977 : f32
    %18 = vector.broadcast %cst_13 : f32 to vector<16x128xf32>
    %19 = arith.mulf %18, %15 : vector<16x128xf32>
    %20 = arith.select %17, %15, %19 : vector<16x128xi1>, vector<16x128xf32>
    %c0_14 = arith.constant 0 : index
    %c0_15 = arith.constant 0 : index
    %21 = vector.load %arg6[%c0_14, %c0_15] : memref<128x64xf32, #tpu.memory_space<vmem>>, vector<128x64xf32>
    %cst_16 = arith.constant dense<0.000000e+00> : vector<16x64xf32>
    %22 = tpu.matmul %10, %21, %cst_16 {dimension_numbers = #tpu.dot_dimension_numbers<[1], [0], [0], [1], [0, 0, 1, 1], [], []>} : vector<16x128xf32>, vector<128x64xf32>, vector<16x64xf32> -> vector<16x64xf32>
    %c0_17 = arith.constant 0 : index
    %c0_18 = arith.constant 0 : index
    %23 = vector.load %arg7[%c0_17, %c0_18] : memref<1x64xf32, #tpu.memory_space<vmem>>, vector<1x64xf32>
    %24 = vector.broadcast %23 : vector<1x64xf32> to vector<16x64xf32>
    %25 = arith.addf %22, %24 : vector<16x64xf32>
    %cst_19 = arith.constant 0.000000e+00 : f32
    %26 = vector.broadcast %cst_19 : f32 to vector<16x64xf32>
    %27 = arith.cmpf ogt, %25, %26 : vector<16x64xf32>
    %cst_20 = arith.constant 0.00999999977 : f32
    %28 = vector.broadcast %cst_20 : f32 to vector<16x64xf32>
    %29 = arith.mulf %28, %25 : vector<16x64xf32>
    %30 = arith.select %27, %25, %29 : vector<16x64xi1>, vector<16x64xf32>
    %c0_21 = arith.constant 0 : index
    %c0_22 = arith.constant 0 : index
    %31 = vector.load %arg8[%c0_21, %c0_22] : memref<64x16xf32, #tpu.memory_space<vmem>>, vector<64x16xf32>
    %cst_23 = arith.constant dense<0.000000e+00> : vector<16x16xf32>
    %32 = tpu.matmul %30, %31, %cst_23 {dimension_numbers = #tpu.dot_dimension_numbers<[1], [0], [0], [1], [0, 0, 1, 1], [], []>} : vector<16x64xf32>, vector<64x16xf32>, vector<16x16xf32> -> vector<16x16xf32>
    %c0_24 = arith.constant 0 : index
    %c0_25 = arith.constant 0 : index
    %33 = vector.load %arg9[%c0_24, %c0_25] : memref<1x16xf32, #tpu.memory_space<vmem>>, vector<1x16xf32>
    %34 = vector.broadcast %33 : vector<1x16xf32> to vector<16x16xf32>
    %35 = arith.addf %32, %34 : vector<16x16xf32>
    %cst_26 = arith.constant 0.000000e+00 : f32
    %36 = vector.broadcast %cst_26 : f32 to vector<16x16xf32>
    %37 = arith.cmpf ogt, %35, %36 : vector<16x16xf32>
    %cst_27 = arith.constant 0.00999999977 : f32
    %38 = vector.broadcast %cst_27 : f32 to vector<16x16xf32>
    %39 = arith.mulf %38, %35 : vector<16x16xf32>
    %40 = arith.select %37, %35, %39 : vector<16x16xi1>, vector<16x16xf32>
    %c0_28 = arith.constant 0 : index
    %c0_29 = arith.constant 0 : index
    %41 = vector.load %arg10[%c0_28, %c0_29] : memref<16x128xf32, #tpu.memory_space<vmem>>, vector<16x128xf32>
    %cst_30 = arith.constant dense<0.000000e+00> : vector<16x128xf32>
    %42 = tpu.matmul %40, %41, %cst_30 {dimension_numbers = #tpu.dot_dimension_numbers<[1], [0], [0], [1], [0, 0, 1, 1], [], []>} : vector<16x16xf32>, vector<16x128xf32>, vector<16x128xf32> -> vector<16x128xf32>
    %c0_31 = arith.constant 0 : index
    %c0_32 = arith.constant 0 : index
    %43 = vector.load %arg11[%c0_31, %c0_32] : memref<1x128xf32, #tpu.memory_space<vmem>>, vector<1x128xf32>
    %44 = vector.broadcast %43 : vector<1x128xf32> to vector<16x128xf32>
    %45 = arith.addf %42, %44 : vector<16x128xf32>
    %cst_33 = arith.constant 0.000000e+00 : f32
    %46 = vector.broadcast %cst_33 : f32 to vector<16x128xf32>
    %47 = arith.cmpf ogt, %45, %46 : vector<16x128xf32>
    %cst_34 = arith.constant 0.00999999977 : f32
    %48 = vector.broadcast %cst_34 : f32 to vector<16x128xf32>
    %49 = arith.mulf %48, %45 : vector<16x128xf32>
    %50 = arith.select %47, %45, %49 : vector<16x128xi1>, vector<16x128xf32>
    %51 = arith.addf %20, %50 : vector<16x128xf32>
    %c0_35 = arith.constant 0 : index
    %c0_36 = arith.constant 0 : index
    %52 = vector.load %arg26[%c0_35, %c0_36] : memref<16x128xf32, #tpu.memory_space<vmem>>, vector<16x128xf32>
    tpu.vector_store %arg26[%c0_35, %c0_36], %51 {strides = array<i32>} : memref<16x128xf32, #tpu.memory_space<vmem>>, vector<16x128xf32>,
    %c0_37 = arith.constant 0 : index
    %c0_38 = arith.constant 0 : index
    %53 = vector.load %arg12[%c0_37, %c0_38] : memref<128x64xf32, #tpu.memory_space<vmem>>, vector<128x64xf32>
    %cst_39 = arith.constant dense<0.000000e+00> : vector<16x64xf32>
    %54 = tpu.matmul %20, %53, %cst_39 {dimension_numbers = #tpu.dot_dimension_numbers<[1], [0], [0], [1], [0, 0, 1, 1], [], []>} : vector<16x128xf32>, vector<128x64xf32>, vector<16x64xf32> -> vector<16x64xf32>
    %c0_40 = arith.constant 0 : index
    %c0_41 = arith.constant 0 : index
    %55 = vector.load %arg13[%c0_40, %c0_41] : memref<1x64xf32, #tpu.memory_space<vmem>>, vector<1x64xf32>
    %56 = vector.broadcast %55 : vector<1x64xf32> to vector<16x64xf32>
    %57 = arith.addf %54, %56 : vector<16x64xf32>
    %cst_42 = arith.constant 0.000000e+00 : f32
    %58 = vector.broadcast %cst_42 : f32 to vector<16x64xf32>
    %59 = arith.cmpf ogt, %57, %58 : vector<16x64xf32>
    %cst_43 = arith.constant 0.00999999977 : f32
    %60 = vector.broadcast %cst_43 : f32 to vector<16x64xf32>
    %61 = arith.mulf %60, %57 : vector<16x64xf32>
    %62 = arith.select %59, %57, %61 : vector<16x64xi1>, vector<16x64xf32>
    %c0_44 = arith.constant 0 : index
    %c0_45 = arith.constant 0 : index
    %63 = vector.load %arg14[%c0_44, %c0_45] : memref<64x128xf32, #tpu.memory_space<vmem>>, vector<64x128xf32>
    %cst_46 = arith.constant dense<0.000000e+00> : vector<16x128xf32>
    %64 = tpu.matmul %62, %63, %cst_46 {dimension_numbers = #tpu.dot_dimension_numbers<[1], [0], [0], [1], [0, 0, 1, 1], [], []>} : vector<16x64xf32>, vector<64x128xf32>, vector<16x128xf32> -> vector<16x128xf32>
    %c0_47 = arith.constant 0 : index
    %c0_48 = arith.constant 0 : index
    %65 = vector.load %arg15[%c0_47, %c0_48] : memref<1x128xf32, #tpu.memory_space<vmem>>, vector<1x128xf32>
    %66 = vector.broadcast %65 : vector<1x128xf32> to vector<16x128xf32>
    %67 = arith.addf %64, %66 : vector<16x128xf32>
    %c0_49 = arith.constant 0 : index
    %c0_50 = arith.constant 0 : index
    %68 = vector.load %arg27[%c0_49, %c0_50] : memref<16x128xf32, #tpu.memory_space<vmem>>, vector<16x128xf32>
    tpu.vector_store %arg27[%c0_49, %c0_50], %67 {strides = array<i32>} : memref<16x128xf32, #tpu.memory_space<vmem>>, vector<16x128xf32>,
    %c0_51 = arith.constant 0 : index
    %c0_52 = arith.constant 0 : index
    %69 = vector.load %arg16[%c0_51, %c0_52] : memref<128x32xf32, #tpu.memory_space<vmem>>, vector<128x32xf32>
    %cst_53 = arith.constant dense<0.000000e+00> : vector<16x32xf32>
    %70 = tpu.matmul %50, %69, %cst_53 {dimension_numbers = #tpu.dot_dimension_numbers<[1], [0], [0], [1], [0, 0, 1, 1], [], []>} : vector<16x128xf32>, vector<128x32xf32>, vector<16x32xf32> -> vector<16x32xf32>
    %c0_54 = arith.constant 0 : index
    %c0_55 = arith.constant 0 : index
    %71 = vector.load %arg17[%c0_54, %c0_55] : memref<1x32xf32, #tpu.memory_space<vmem>>, vector<1x32xf32>
    %72 = vector.broadcast %71 : vector<1x32xf32> to vector<16x32xf32>
    %73 = arith.addf %70, %72 : vector<16x32xf32>
    %cst_56 = arith.constant 0.000000e+00 : f32
    %74 = vector.broadcast %cst_56 : f32 to vector<16x32xf32>
    %75 = arith.cmpf ogt, %73, %74 : vector<16x32xf32>
    %cst_57 = arith.constant 0.00999999977 : f32
    %76 = vector.broadcast %cst_57 : f32 to vector<16x32xf32>
    %77 = arith.mulf %76, %73 : vector<16x32xf32>
    %78 = arith.select %75, %73, %77 : vector<16x32xi1>, vector<16x32xf32>
    %c0_58 = arith.constant 0 : index
    %c0_59 = arith.constant 0 : index
    %79 = vector.load %arg18[%c0_58, %c0_59] : memref<32x64xf32, #tpu.memory_space<vmem>>, vector<32x64xf32>
    %cst_60 = arith.constant dense<0.000000e+00> : vector<16x64xf32>
    %80 = tpu.matmul %78, %79, %cst_60 {dimension_numbers = #tpu.dot_dimension_numbers<[1], [0], [0], [1], [0, 0, 1, 1], [], []>} : vector<16x32xf32>, vector<32x64xf32>, vector<16x64xf32> -> vector<16x64xf32>
    %c0_61 = arith.constant 0 : index
    %c0_62 = arith.constant 0 : index
    %81 = vector.load %arg19[%c0_61, %c0_62] : memref<1x64xf32, #tpu.memory_space<vmem>>, vector<1x64xf32>
    %82 = vector.broadcast %81 : vector<1x64xf32> to vector<16x64xf32>
    %83 = arith.addf %80, %82 : vector<16x64xf32>
    %cst_63 = arith.constant 0.000000e+00 : f32
    %84 = vector.broadcast %cst_63 : f32 to vector<16x64xf32>
    %85 = arith.cmpf ogt, %83, %84 : vector<16x64xf32>
    %cst_64 = arith.constant 0.00999999977 : f32
    %86 = vector.broadcast %cst_64 : f32 to vector<16x64xf32>
    %87 = arith.mulf %86, %83 : vector<16x64xf32>
    %88 = arith.select %85, %83, %87 : vector<16x64xi1>, vector<16x64xf32>
    %c0_65 = arith.constant 0 : index
    %c0_66 = arith.constant 0 : index
    %89 = vector.load %arg20[%c0_65, %c0_66] : memref<64x128xf32, #tpu.memory_space<vmem>>, vector<64x128xf32>
    %cst_67 = arith.constant dense<0.000000e+00> : vector<16x128xf32>
    %90 = tpu.matmul %88, %89, %cst_67 {dimension_numbers = #tpu.dot_dimension_numbers<[1], [0], [0], [1], [0, 0, 1, 1], [], []>} : vector<16x64xf32>, vector<64x128xf32>, vector<16x128xf32> -> vector<16x128xf32>
    %c0_68 = arith.constant 0 : index
    %c0_69 = arith.constant 0 : index
    %91 = vector.load %arg21[%c0_68, %c0_69] : memref<1x128xf32, #tpu.memory_space<vmem>>, vector<1x128xf32>
    %92 = vector.broadcast %91 : vector<1x128xf32> to vector<16x128xf32>
    %93 = arith.addf %90, %92 : vector<16x128xf32>
    %c0_70 = arith.constant 0 : index
    %c0_71 = arith.constant 0 : index
    %94 = vector.load %arg28[%c0_70, %c0_71] : memref<16x128xf32, #tpu.memory_space<vmem>>, vector<16x128xf32>
    tpu.vector_store %arg28[%c0_70, %c0_71], %93 {strides = array<i32>} : memref<16x128xf32, #tpu.memory_space<vmem>>, vector<16x128xf32>,
    %c0_72 = arith.constant 0 : index
    %c0_73 = arith.constant 0 : index
    %95 = vector.load %arg22[%c0_72, %c0_73] : memref<128x16xf32, #tpu.memory_space<vmem>>, vector<128x16xf32>
    %cst_74 = arith.constant dense<0.000000e+00> : vector<16x16xf32>
    %96 = tpu.matmul %51, %95, %cst_74 {dimension_numbers = #tpu.dot_dimension_numbers<[1], [0], [0], [1], [0, 0, 1, 1], [], []>} : vector<16x128xf32>, vector<128x16xf32>, vector<16x16xf32> -> vector<16x16xf32>
    %c0_75 = arith.constant 0 : index
    %c0_76 = arith.constant 0 : index
    %97 = vector.load %arg23[%c0_75, %c0_76] : memref<1x16xf32, #tpu.memory_space<vmem>>, vector<1x16xf32>
    %98 = vector.broadcast %97 : vector<1x16xf32> to vector<16x16xf32>
    %99 = arith.addf %96, %98 : vector<16x16xf32>
    %cst_77 = arith.constant 0.000000e+00 : f32
    %100 = vector.broadcast %cst_77 : f32 to vector<16x16xf32>
    %101 = arith.cmpf ogt, %99, %100 : vector<16x16xf32>
    %cst_78 = arith.constant 0.00999999977 : f32
    %102 = vector.broadcast %cst_78 : f32 to vector<16x16xf32>
    %103 = arith.mulf %102, %99 : vector<16x16xf32>
    %104 = arith.select %101, %99, %103 : vector<16x16xi1>, vector<16x16xf32>
    %c0_79 = arith.constant 0 : index
    %c0_80 = arith.constant 0 : index
    %105 = vector.load %arg24[%c0_79, %c0_80] : memref<16x128xf32, #tpu.memory_space<vmem>>, vector<16x128xf32>
    %cst_81 = arith.constant dense<0.000000e+00> : vector<16x128xf32>
    %106 = tpu.matmul %104, %105, %cst_81 {dimension_numbers = #tpu.dot_dimension_numbers<[1], [0], [0], [1], [0, 0, 1, 1], [], []>} : vector<16x16xf32>, vector<16x128xf32>, vector<16x128xf32> -> vector<16x128xf32>
    %c0_82 = arith.constant 0 : index
    %c0_83 = arith.constant 0 : index
    %107 = vector.load %arg25[%c0_82, %c0_83] : memref<1x128xf32, #tpu.memory_space<vmem>>, vector<1x128xf32>
    %108 = vector.broadcast %107 : vector<1x128xf32> to vector<16x128xf32>
    %109 = arith.addf %106, %108 : vector<16x128xf32>
    %cst_84 = arith.constant 0.000000e+00 : f32
    %110 = vector.broadcast %cst_84 : f32 to vector<16x128xf32>
    %111 = arith.maximumf %109, %110 : vector<16x128xf32>
    %c0_85 = arith.constant 0 : index
    %c0_86 = arith.constant 0 : index
    %112 = vector.load %arg29[%c0_85, %c0_86] : memref<16x128xf32, #tpu.memory_space<vmem>>, vector<16x128xf32>
    tpu.vector_store %arg29[%c0_85, %c0_86], %111 {strides = array<i32>} : memref<16x128xf32, #tpu.memory_space<vmem>>, vector<16x128xf32>,
    return
  }
  func.func @transform_0(%arg0: i32) -> (i32, i32) {
    %c0_i32 = arith.constant 0 : i32
    %c0_i32_0 = arith.constant 0 : i32
    return %arg0, %c0_i32 : i32, i32
  }
  func.func @transform_1(%arg0: i32) -> (i32, i32) {
    %c0_i32 = arith.constant 0 : i32
    %c0_i32_0 = arith.constant 0 : i32
    %c0_i32_1 = arith.constant 0 : i32
    return %c0_i32, %c0_i32_0 : i32, i32
  }
  func.func @transform_2(%arg0: i32) -> (i32, i32) {
    %c0_i32 = arith.constant 0 : i32
    %c0_i32_0 = arith.constant 0 : i32
    %c0_i32_1 = arith.constant 0 : i32
    return %c0_i32, %c0_i32_0 : i32, i32
  }
  func.func @transform_3(%arg0: i32) -> (i32, i32) {
    %c0_i32 = arith.constant 0 : i32
    %c0_i32_0 = arith.constant 0 : i32
    %c0_i32_1 = arith.constant 0 : i32
    return %c0_i32, %c0_i32_0 : i32, i32
  }
  func.func @transform_4(%arg0: i32) -> (i32, i32) {
    %c0_i32 = arith.constant 0 : i32
    %c0_i32_0 = arith.constant 0 : i32
    %c0_i32_1 = arith.constant 0 : i32
    return %c0_i32, %c0_i32_0 : i32, i32
  }
  func.func @transform_5(%arg0: i32) -> (i32, i32) {
    %c0_i32 = arith.constant 0 : i32
    %c0_i32_0 = arith.constant 0 : i32
    %c0_i32_1 = arith.constant 0 : i32
    return %c0_i32, %c0_i32_0 : i32, i32
  }
  func.func @transform_6(%arg0: i32) -> (i32, i32) {
    %c0_i32 = arith.constant 0 : i32
    %c0_i32_0 = arith.constant 0 : i32
    %c0_i32_1 = arith.constant 0 : i32
    return %c0_i32, %c0_i32_0 : i32, i32
  }
  func.func @transform_7(%arg0: i32) -> (i32, i32) {
    %c0_i32 = arith.constant 0 : i32
    %c0_i32_0 = arith.constant 0 : i32
    %c0_i32_1 = arith.constant 0 : i32
    return %c0_i32, %c0_i32_0 : i32, i32
  }
  func.func @transform_8(%arg0: i32) -> (i32, i32) {
    %c0_i32 = arith.constant 0 : i32
    %c0_i32_0 = arith.constant 0 : i32
    %c0_i32_1 = arith.constant 0 : i32
    return %c0_i32, %c0_i32_0 : i32, i32
  }
  func.func @transform_9(%arg0: i32) -> (i32, i32) {
    %c0_i32 = arith.constant 0 : i32
    %c0_i32_0 = arith.constant 0 : i32
    %c0_i32_1 = arith.constant 0 : i32
    return %c0_i32, %c0_i32_0 : i32, i32
  }
  func.func @transform_10(%arg0: i32) -> (i32, i32) {
    %c0_i32 = arith.constant 0 : i32
    %c0_i32_0 = arith.constant 0 : i32
    %c0_i32_1 = arith.constant 0 : i32
    return %c0_i32, %c0_i32_0 : i32, i32
  }
  func.func @transform_11(%arg0: i32) -> (i32, i32) {
    %c0_i32 = arith.constant 0 : i32
    %c0_i32_0 = arith.constant 0 : i32
    %c0_i32_1 = arith.constant 0 : i32
    return %c0_i32, %c0_i32_0 : i32, i32
  }
  func.func @transform_12(%arg0: i32) -> (i32, i32) {
    %c0_i32 = arith.constant 0 : i32
    %c0_i32_0 = arith.constant 0 : i32
    %c0_i32_1 = arith.constant 0 : i32
    return %c0_i32, %c0_i32_0 : i32, i32
  }
  func.func @transform_13(%arg0: i32) -> (i32, i32) {
    %c0_i32 = arith.constant 0 : i32
    %c0_i32_0 = arith.constant 0 : i32
    %c0_i32_1 = arith.constant 0 : i32
    return %c0_i32, %c0_i32_0 : i32, i32
  }
  func.func @transform_14(%arg0: i32) -> (i32, i32) {
    %c0_i32 = arith.constant 0 : i32
    %c0_i32_0 = arith.constant 0 : i32
    %c0_i32_1 = arith.constant 0 : i32
    return %c0_i32, %c0_i32_0 : i32, i32
  }
  func.func @transform_15(%arg0: i32) -> (i32, i32) {
    %c0_i32 = arith.constant 0 : i32
    %c0_i32_0 = arith.constant 0 : i32
    %c0_i32_1 = arith.constant 0 : i32
    return %c0_i32, %c0_i32_0 : i32, i32
  }
  func.func @transform_16(%arg0: i32) -> (i32, i32) {
    %c0_i32 = arith.constant 0 : i32
    %c0_i32_0 = arith.constant 0 : i32
    %c0_i32_1 = arith.constant 0 : i32
    return %c0_i32, %c0_i32_0 : i32, i32
  }
  func.func @transform_17(%arg0: i32) -> (i32, i32) {
    %c0_i32 = arith.constant 0 : i32
    %c0_i32_0 = arith.constant 0 : i32
    %c0_i32_1 = arith.constant 0 : i32
    return %c0_i32, %c0_i32_0 : i32, i32
  }
  func.func @transform_18(%arg0: i32) -> (i32, i32) {
    %c0_i32 = arith.constant 0 : i32
    %c0_i32_0 = arith.constant 0 : i32
    %c0_i32_1 = arith.constant 0 : i32
    return %c0_i32, %c0_i32_0 : i32, i32
  }
  func.func @transform_19(%arg0: i32) -> (i32, i32) {
    %c0_i32 = arith.constant 0 : i32
    %c0_i32_0 = arith.constant 0 : i32
    %c0_i32_1 = arith.constant 0 : i32
    return %c0_i32, %c0_i32_0 : i32, i32
  }
  func.func @transform_20(%arg0: i32) -> (i32, i32) {
    %c0_i32 = arith.constant 0 : i32
    %c0_i32_0 = arith.constant 0 : i32
    %c0_i32_1 = arith.constant 0 : i32
    return %c0_i32, %c0_i32_0 : i32, i32
  }
  func.func @transform_21(%arg0: i32) -> (i32, i32) {
    %c0_i32 = arith.constant 0 : i32
    %c0_i32_0 = arith.constant 0 : i32
    %c0_i32_1 = arith.constant 0 : i32
    return %c0_i32, %c0_i32_0 : i32, i32
  }
  func.func @transform_22(%arg0: i32) -> (i32, i32) {
    %c0_i32 = arith.constant 0 : i32
    %c0_i32_0 = arith.constant 0 : i32
    %c0_i32_1 = arith.constant 0 : i32
    return %c0_i32, %c0_i32_0 : i32, i32
  }
  func.func @transform_23(%arg0: i32) -> (i32, i32) {
    %c0_i32 = arith.constant 0 : i32
    %c0_i32_0 = arith.constant 0 : i32
    %c0_i32_1 = arith.constant 0 : i32
    return %c0_i32, %c0_i32_0 : i32, i32
  }
  func.func @transform_24(%arg0: i32) -> (i32, i32) {
    %c0_i32 = arith.constant 0 : i32
    %c0_i32_0 = arith.constant 0 : i32
    %c0_i32_1 = arith.constant 0 : i32
    return %c0_i32, %c0_i32_0 : i32, i32
  }
  func.func @transform_25(%arg0: i32) -> (i32, i32) {
    %c0_i32 = arith.constant 0 : i32
    %c0_i32_0 = arith.constant 0 : i32
    return %arg0, %c0_i32 : i32, i32
  }
  func.func @transform_26(%arg0: i32) -> (i32, i32) {
    %c0_i32 = arith.constant 0 : i32
    %c0_i32_0 = arith.constant 0 : i32
    return %arg0, %c0_i32 : i32, i32
  }
  func.func @transform_27(%arg0: i32) -> (i32, i32) {
    %c0_i32 = arith.constant 0 : i32
    %c0_i32_0 = arith.constant 0 : i32
    return %arg0, %c0_i32 : i32, i32
  }
  func.func @transform_28(%arg0: i32) -> (i32, i32) {
    %c0_i32 = arith.constant 0 : i32
    %c0_i32_0 = arith.constant 0 : i32
    return %arg0, %c0_i32 : i32, i32
  }
}

</mosaic_0001>

<bundles_post_ra>
// kernel: tpu_custom_call.1
= control target key start
LH: loop header
LB: loop body
LE: loop exit
PB: predicated region body
PF: predicated region fallthrough
CT: control target
= control target key end

     0   :  { %s2855_s0 = inlined_call_operand.vmem [shape: f32[16,128], index: 0, kind: input, shape index: {}]   ;;  %s2856_s1 = inlined_call_operand.vmem [shape: f32[128,128], index: 1, kind: input, shape index: {}]   ;;  %s2857_s2 = inlined_call_operand.vmem [shape: f32[1,128], index: 2, kind: input, shape index: {}]   ;;  %s2858_s3 = inlined_call_operand.vmem [shape: f32[128,128], index: 3, kind: input, shape index: {}]   ;;  %s2859_s4 = inlined_call_operand.vmem [shape: f32[1,128], index: 4, kind: input, shape index: {}]   ;;  %s2860_s5 = inlined_call_operand.vmem [shape: f32[128,64], index: 5, kind: input, shape index: {}]   ;;  %s2861_s6 = inlined_call_operand.vmem [shape: f32[1,64], index: 6, kind: input, shape index: {}]   ;;  %s2862_s7 = inlined_call_operand.vmem [shape: f32[64,16], index: 7, kind: input, shape index: {}]   ;;  %s2863_s8 = inlined_call_operand.vmem [shape: f32[1,16], index: 8, kind: input, shape index: {}]   ;;  %s2864_s9 = inlined_call_operand.vmem [shape: f32[16,128], index: 9, kind: input, shape index: {}]   ;;  %s2865_s10 = inlined_call_operand.vmem [shape: f32[1,128], index: 10, kind: input, shape index: {}]   ;;  %s2866_s11 = inlined_call_operand.vmem [shape: f32[128,64], index: 11, kind: input, shape index: {}]   ;;  %s2867_s12 = inlined_call_operand.vmem [shape: f32[1,64], index: 12, kind: input, shape index: {}]   ;;  %s2868_s13 = inlined_call_operand.vmem [shape: f32[64,128], index: 13, kind: input, shape index: {}]   ;;  %s2869_s14 = inlined_call_operand.vmem [shape: f32[1,128], index: 14, kind: input, shape index: {}]   ;;  %s2870_s15 = inlined_call_operand.vmem [shape: f32[128,32], index: 15, kind: input, shape index: {}]   ;;  %s2871_s16 = inlined_call_operand.vmem [shape: f32[1,32], index: 16, kind: input, shape index: {}]   ;;  %s2872_s17 = inlined_call_operand.vmem [shape: f32[32,64], index: 17, kind: input, shape index: {}]   ;;  %s2873_s18 = inlined_call_operand.vmem [shape: f32[1,64], index: 18, kind: input, shape index: {}]   ;;  %s2874_s19 = inlined_call_operand.vmem [shape: f32[64,128], index: 19, kind: input, shape index: {}]   ;;  %s2875_s20 = inlined_call_operand.vmem [shape: f32[1,128], index: 20, kind: input, shape index: {}]   ;;  %s2876_s21 = inlined_call_operand.vmem [shape: f32[128,16], index: 21, kind: input, shape index: {}]   ;;  %s2877_s22 = inlined_call_operand.vmem [shape: f32[1,16], index: 22, kind: input, shape index: {}]   ;;  %s2878_s23 = inlined_call_operand.vmem [shape: f32[16,128], index: 23, kind: input, shape index: {}]   ;;  %s2879_s24 = inlined_call_operand.vmem [shape: f32[1,128], index: 24, kind: input, shape index: {}]   ;;  %s2880_s25 = inlined_call_operand.hbm [shape: f32[16,128], index: 25, kind: output, shape index: {0}]   ;;  %s2881_s26 = inlined_call_operand.hbm [shape: f32[16,128], index: 26, kind: output, shape index: {1}]   ;;  %s2882_s27 = inlined_call_operand.hbm [shape: f32[16,128], index: 27, kind: output, shape index: {2}]   ;;  %s2883_s28 = inlined_call_operand.hbm [shape: f32[16,128], index: 28, kind: output, shape index: {3}]  }
   0x1   :  { %2891 = sst [smem:[#allocation12_spill]] %s2855_s0 }
   0x2   :  { %2892 = sst [smem:[#allocation13_spill]] %s2856_s1 }
   0x3   :  { %2893 = sst [smem:[#allocation14_spill]] %s2857_s2 }
   0x4   :  { %2894 = sst [smem:[#allocation15_spill]] %s2858_s3 }
   0x5   :  { %2895 = sst [smem:[#allocation16_spill]] %s2859_s4 }
   0x6   :  { %2896 = sst [smem:[#allocation17_spill]] %s2860_s5 }
   0x7   :  { %2897 = sst [smem:[#allocation18_spill]] %s2861_s6 }
   0x8   :  { %2898 = sst [smem:[#allocation19_spill]] %s2862_s7 }
   0x9   :  { %2899 = sst [smem:[#allocation20_spill]] %s2863_s8 }
   0xa   :  { %2900 = sst [smem:[#allocation21_spill]] %s2864_s9 }
   0xb   :  { %2901 = sst [smem:[#allocation22_spill]] %s2865_s10 }
   0xc   :  { %2902 = sst [smem:[#allocation23_spill]] %s2866_s11 }
   0xd   :  { %2903 = sst [smem:[#allocation24_spill]] %s2867_s12 }
   0xe   :  { %34 = vsyncpa [#allocation3], 0 }
   0xf   :  { %35 = vsyncpa [#allocation5], 0  ;;  %s2904_s9 = sld [smem:[#allocation13_spill]]  ;;  %s2905_s30 = sld [smem:[#allocation12_spill]] }
  0x10   :  { %s2906_s11 = sld [smem:[#allocation15_spill]] }
  0x15   :  { %v89_v0 = vld [vmem:[%s2904_s9] sm:$0xff]  ;;  %v90_v1 = vld [vmem:[%s2904_s9 + $0x8] sm:$0xff]  ;;  %v91_v2 = vld [vmem:[%s2904_s9 + $0x10] sm:$0xff] }
  0x16   :  { %v1837_v3 = vpack.c.bf16 %v90_v1, %v89_v0  ;;  %v92_v4 = vld [vmem:[%s2904_s9 + $0x18] sm:$0xff]  ;;  %v93_v6 = vld [vmem:[%s2904_s9 + $0x20] sm:$0xff]  ;;  %v94_v7 = vld [vmem:[%s2904_s9 + $0x28] sm:$0xff] }
  0x17   :  { %v1841_v5 = vpack.c.bf16 %v92_v4, %v91_v2  ;;  %v1845_v8 = vpack.c.bf16 %v94_v7, %v93_v6  ;;  %v95_v9 = vld [vmem:[%s2904_s9 + $0x30] sm:$0xff]  ;;  %v87_v10 = vld [vmem:[%s2905_s30] sm:$0xff]  ;;  %v96_v11 = vld [vmem:[%s2904_s9 + $0x38] sm:$0xff] }
  0x18   :  { %1838 = vmatprep.subr.bf16.mxu0 %v1837_v3  ;;  %1577 = vmatprep.mubr.f32.mxu0 %v87_v10  ;;  %v193_v12 = vld [vmem:[%s2906_s11] sm:$0xff]  ;;  %v194_v13 = vld [vmem:[%s2906_s11 + $0x8] sm:$0xff]  ;;  %v195_v15 = vld [vmem:[%s2906_s11 + $0x10] sm:$0xff]  ;;  %v1849_v19 = vpack.c.bf16 %v96_v11, %v95_v9 }
  0x19   :  { %1840 = vmatpush3.bf16.msra.mxu0 %v1837_v3  ;;  %v1869_v14 = vpack.c.bf16 %v194_v13, %v193_v12  ;;  %v196_v16 = vld [vmem:[%s2906_s11 + $0x18] sm:$0xff]  ;;  %v197_v18 = vld [vmem:[%s2906_s11 + $0x20] sm:$0xff]  ;;  %v198_v20 = vld [vmem:[%s2906_s11 + $0x28] sm:$0xff] }
  0x1a   :  { %1842 = vmatprep.subr.bf16.mxu0 %v1841_v5  ;;  %v1873_v17 = vpack.c.bf16 %v196_v16, %v195_v15  ;;  %v97_v21 = vld [vmem:[%s2904_s9 + $0x40] sm:$0xff]  ;;  %v98_v22 = vld [vmem:[%s2904_s9 + $0x48] sm:$0xff]  ;;  %v1877_v23 = vpack.c.bf16 %v198_v20, %v197_v18  ;;  %v199_v24 = vld [vmem:[%s2906_s11 + $0x30] sm:$0xff] }
  0x1b   :  { %1870 = vmatprep.subr.bf16.mxu1 %v1869_v14  ;;  %v200_v25 = vld [vmem:[%s2906_s11 + $0x38] sm:$0xff]  ;;  %v1853_v26 = vpack.c.bf16 %v98_v22, %v97_v21  ;;  %v99_v27 = vld [vmem:[%s2904_s9 + $0x50] sm:$0xff] }
  0x1c   :  { %1872 = vmatpush3.bf16.msra.mxu1 %v1869_v14  ;;  %v100_v28 = vld [vmem:[%s2904_s9 + $0x58] sm:$0xff] }
  0x1d   :  { %1844 = vmatpush3.bf16.msra.mxu0 %v1841_v5  ;;  %1874 = vmatprep.subr.bf16.mxu1 %v1873_v17 }
  0x1e   :  { %1846 = vmatprep.subr.bf16.mxu0 %v1845_v8 }
  0x20   :  { %1876 = vmatpush3.bf16.msra.mxu1 %v1873_v17 }
  0x21   :  { %1848 = vmatpush3.bf16.msra.mxu0 %v1845_v8 }
  0x22   :  { %1850 = vmatprep.subr.bf16.mxu0 %v1849_v19 }
  0x23   :  { %36 = vsyncpa [#allocation8], 0  ;;  %1878 = vmatprep.subr.bf16.mxu1 %v1877_v23  ;;  %v1881_v29 = vpack.c.bf16 %v200_v25, %v199_v24  ;;  %v201_v30 = vld [vmem:[%s2906_s11 + $0x40] sm:$0xff]  ;;  %v202_v31 = vld [vmem:[%s2906_s11 + $0x48] sm:$0xff]  ;;  %v1857_v32 = vpack.c.bf16 %v100_v28, %v99_v27  ;;  %s2907_s1 = sld [smem:[#allocation17_spill]]  ;;  %s2908_s5 = sld [smem:[#allocation19_spill]] }
  0x24   :  { %v101_v33 = vld [vmem:[%s2904_s9 + $0x60] sm:$0xff]  ;;  %v102_v34 = vld [vmem:[%s2904_s9 + $0x68] sm:$0xff]  ;;  %1880 = vmatpush3.bf16.msra.mxu1 %v1877_v23  ;;  %v1885_v35 = vpack.c.bf16 %v202_v31, %v201_v30  ;;  %v203_v36 = vld [vmem:[%s2906_s11 + $0x50] sm:$0xff]  ;;  %s2909_s0 = sld [smem:[#allocation14_spill]]  ;;  %vm416_vm4 = vcmask 523264   ;;  %s2911_s2 = sld [smem:[#allocation21_spill]] }
  0x25   :  { %1852 = vmatpush3.bf16.msra.mxu0 %v1849_v19  ;;  %1882 = vmatprep.subr.bf16.mxu1 %v1881_v29  ;;  %v204_v37 = vld [vmem:[%s2906_s11 + $0x58] sm:$0xff]  ;;  %v1861_v38 = vpack.c.bf16 %v102_v34, %v101_v33  ;;  %v103_v39 = vld [vmem:[%s2904_s9 + $0x70] sm:$0xff]  ;;  %v88_v48 = vld [vmem:[%s2905_s30 + $0x8] sm:$0xff]  ;;  %s2913_s10 = sld [smem:[#allocation16_spill]]  ;;  %vm513_vm7 = vcmask 130048   ;;  %s2915_s30 = sld [smem:[#allocation22_spill]] }
  0x26   :  { %1854 = vmatprep.subr.bf16.mxu0 %v1853_v26  ;;  %v104_v40 = vld [vmem:[%s2904_s9 + $0x78] sm:$0xff]  ;;  %v1889_v41 = vpack.c.bf16 %v204_v37, %v203_v36  ;;  %v205_v62 = vld [vmem:[%s2906_s11 + $0x60] sm:$0xff]  ;;  %v206_v63 = vld [vmem:[%s2906_s11 + $0x68] sm:$0xff]  ;;  %s2912_s9 = sld [smem:[#allocation23_spill]]  ;;  %s2916_s3 = sld [smem:[#allocation24_spill]] }
  0x27   :  { %v1865_v42 = vpack.c.bf16 %v104_v40, %v103_v39  ;;  %v1893_v1 = vpack.c.bf16 %v206_v63, %v205_v62  ;;  %v207_v4 = vld [vmem:[%s2906_s11 + $0x70] sm:$0xff]  ;;  %v208_v5 = vld [vmem:[%s2906_s11 + $0x78] sm:$0xff] }
  0x28   :  { %1884 = vmatpush3.bf16.msra.mxu1 %v1881_v29  ;;  %v1897_v7 = vpack.c.bf16 %v208_v5, %v207_v4 }
  0x29   :  { %1856 = vmatpush3.bf16.msra.mxu0 %v1853_v26  ;;  %1886 = vmatprep.subr.bf16.mxu1 %v1885_v35  ;;  %v297_v43 = vld [vmem:[%s2907_s1] sm:$0xff]  ;;  %v298_v44 = vld [vmem:[%s2907_s1 + $0x8] sm:$0xff]  ;;  %v299_v46 = vld [vmem:[%s2907_s1 + $0x10] sm:$0xff] }
  0x2a   :  { %1858 = vmatprep.subr.bf16.mxu0 %v1857_v32  ;;  %v1901_v45 = vpack.c.bf16 %v298_v44, %v297_v43  ;;  %v300_v47 = vld [vmem:[%s2907_s1 + $0x18] sm:$0xff]  ;;  %v301_v50 = vld [vmem:[%s2907_s1 + $0x20] sm:$0xff]  ;;  %v302_v51 = vld [vmem:[%s2907_s1 + $0x28] sm:$0xff] }
  0x2b   :  { %v1905_v49 = vpack.c.bf16 %v300_v47, %v299_v46  ;;  %v1909_v52 = vpack.c.bf16 %v302_v51, %v301_v50  ;;  %v303_v53 = vld [vmem:[%s2907_s1 + $0x30] sm:$0xff]  ;;  %v304_v54 = vld [vmem:[%s2907_s1 + $0x38] sm:$0xff]  ;;  %v305_v56 = vld [vmem:[%s2907_s1 + $0x40] sm:$0xff] }
  0x2c   :  { %1888 = vmatpush3.bf16.msra.mxu1 %v1885_v35  ;;  %v1913_v55 = vpack.c.bf16 %v304_v54, %v303_v53  ;;  %v306_v57 = vld [vmem:[%s2907_s1 + $0x48] sm:$0xff]  ;;  %v307_v59 = vld [vmem:[%s2907_s1 + $0x50] sm:$0xff]  ;;  %v308_v60 = vld [vmem:[%s2907_s1 + $0x58] sm:$0xff] }
  0x2d   :  { %1860 = vmatpush3.bf16.msra.mxu0 %v1857_v32  ;;  %1890 = vmatprep.subr.bf16.mxu1 %v1889_v41  ;;  %v1917_v58 = vpack.c.bf16 %v306_v57, %v305_v56  ;;  %v1921_v61 = vpack.c.bf16 %v308_v60, %v307_v59  ;;  %v309_v0 = vld [vmem:[%s2907_s1 + $0x60] sm:$0xff]  ;;  %v310_v2 = vld [vmem:[%s2907_s1 + $0x68] sm:$0xff]  ;;  %v311_v6 = vld [vmem:[%s2907_s1 + $0x70] sm:$0xff] }
  0x2e   :  { %1862 = vmatprep.subr.bf16.mxu0 %v1861_v38  ;;  %v1925_v3 = vpack.c.bf16 %v310_v2, %v309_v0  ;;  %v312_v8 = vld [vmem:[%s2907_s1 + $0x78] sm:$0xff]  ;;  %v401_v10 = vld [vmem:[%s2908_s5] sm:$0xff]  ;;  %v402_v11 = vld [vmem:[%s2908_s5 + $0x8] sm:$0xff]  ;;  %s2910_s1 = sld [smem:[#allocation18_spill]] }
  0x2f   :  { %v1929_v9 = vpack.c.bf16 %v312_v8, %v311_v6  ;;  %v1933_v12 = vpack.c.bf16 %v402_v11, %v401_v10  ;;  %v1369_v13 = vld [vmem:[%s2909_s0] ss:$0 sm:$0xff]  ;;  %v403_v19 = vld [vmem:[%s2908_s5 + $0x10] sm:$0xff]  ;;  %v404_v20 = vld [vmem:[%s2908_s5 + $0x18] sm:$0xff] }
  0x30   :  { %1892 = vmatpush3.bf16.msra.mxu1 %v1889_v41  ;;  %v1937_v23 = vpack.c.bf16 %v404_v20, %v403_v19  ;;  %v405_v25 = vld [vmem:[%s2908_s5 + $0x20] sm:$0xff]  ;;  %v406_v26 = vld [vmem:[%s2908_s5 + $0x28] sm:$0xff]  ;;  %v407_v28 = vld [vmem:[%s2908_s5 + $0x30] sm:$0xff] }
  0x31   :  { %1864 = vmatpush3.bf16.msra.mxu0 %v1861_v38  ;;  %1894 = vmatprep.subr.bf16.mxu1 %v1893_v1  ;;  %v1941_v27 = vpack.c.bf16 %v406_v26, %v405_v25  ;;  %v408_v29 = vld [vmem:[%s2908_s5 + $0x38] sm:$0xff]  ;;  %v505_v43 = vld [vmem:[%s2911_s2 + $0x8] sm:$0xff]  ;;  %s2914_s5 = sld [smem:[#allocation20_spill]]  ;;  %v607_v57 = vld [vmem:[%s2912_s9 + $0x10] sm:$0xff] }
  0x32   :  { %1866 = vmatprep.subr.bf16.mxu0 %v1865_v42  ;;  %v1945_v30 = vpack.c.bf16 %v408_v29, %v407_v28  ;;  %v606_v46 = vld [vmem:[%s2912_s9 + $0x8] sm:$0xff]  ;;  %v609_v63 = vld [vmem:[%s2912_s9 + $0x20] sm:$0xff]  ;;  %v612_v4 = vld [vmem:[%s2912_s9 + $0x38] sm:$0xff] }
  0x33   :  { %v610_v0 = vld [vmem:[%s2912_s9 + $0x28] sm:$0xff]  ;;  %v613_v6 = vld [vmem:[%s2912_s9 + $0x40] sm:$0xff]  ;;  %v616_v10 = vld [vmem:[%s2912_s9 + $0x58] sm:$0xff] }
  0x34   :  { %1896 = vmatpush3.bf16.msra.mxu1 %v1893_v1  ;;  %v1371_v31 = vld [vmem:[%s2910_s1] ss:$0 sm:$0xff]  ;;  %v1961_v2 = vpack.c.bf16 %v610_v0, %v609_v63  ;;  %v712_v25 = vld [vmem:[%s2868_s13 + $0x18] sm:$0xff]  ;;  %v714_v28 = vld [vmem:[%s2868_s13 + $0x28] sm:$0xff] }
  0x35   :  { %1868 = vmatpush3.bf16.msra.mxu0 %v1865_v42  ;;  %1898 = vmatprep.subr.bf16.mxu1 %v1897_v7  ;;  %v504_v42 = vld [vmem:[%s2911_s2] sm:$0xff]  ;;  %v814_v63 = vld [vmem:[%s2870_s15 + $0x38] sm:$0xff] }
  0x36   :  { %1902 = vmatprep.subr.bf16.mxu0 %v1901_v45  ;;  %v1949_v44 = vpack.c.bf16 %v505_v43, %v504_v42 }
  0x38   :  { %1578 = vmatmul.mubr.f32.vlgmr.msra.gmra.mrb[0].mxu0 %v88_v48  ;;  %1900 = vmatpush3.bf16.msra.mxu1 %v1897_v7  ;;  %v1370_v48 = vld [vmem:[%s2913_s10] ss:$0 sm:$0xff]  ;;  %v614_v7 = vld [vmem:[%s2912_s9 + $0x48] sm:$0xff] }
  0x39   :  { %1904 = vmatpush3.bf16.msra.mxu0 %v1901_v45  ;;  %1950 = vmatprep.subr.bf16.mxu1 %v1949_v44  ;;  %v605_v45 = vld [vmem:[%s2912_s9] sm:$0xff]  ;;  %v1969_v8 = vpack.c.bf16 %v614_v7, %v613_v6 }
  0x3a   :  { %1906 = vmatprep.subr.bf16.mxu0 %v1905_v49  ;;  %v1953_v47 = vpack.c.bf16 %v606_v46, %v605_v45  ;;  %v819_v7 = vld [vmem:[%s2870_s15 + $0x60] sm:$0xff] }
  0x3d   :  { %1908 = vmatpush3.bf16.msra.mxu0 %v1905_v49  ;;  %v1372_v49 = vld [vmem:[%s2914_s5] ss:$0 sm:$0xff] }
  0x3e   :  { %1910 = vmatprep.subr.bf16.mxu0 %v1909_v52 }
  0x41   :  { %1912 = vmatpush3.bf16.msra.mxu0 %v1909_v52 }
  0x42   :  { %1914 = vmatprep.subr.bf16.mxu0 %v1913_v55 }
  0x45   :  { %1916 = vmatpush3.bf16.msra.mxu0 %v1913_v55 }
  0x46   :  { %1918 = vmatprep.subr.bf16.mxu0 %v1917_v58 }
  0x49   :  { %1920 = vmatpush3.bf16.msra.mxu0 %v1917_v58  ;;  %v608_v58 = vld [vmem:[%s2912_s9 + $0x18] sm:$0xff] }
  0x4a   :  { %1922 = vmatprep.subr.bf16.mxu0 %v1921_v61 }
  0x4d   :  { %1924 = vmatpush3.bf16.msra.mxu0 %v1921_v61  ;;  %v1957_v61 = vpack.c.bf16 %v608_v58, %v607_v57 }
  0x4e   :  { %1926 = vmatprep.subr.bf16.mxu0 %v1925_v3 }
  0x51   :  { %1928 = vmatpush3.bf16.msra.mxu0 %v1925_v3  ;;  %v611_v3 = vld [vmem:[%s2912_s9 + $0x30] sm:$0xff] }
  0x52   :  { %1930 = vmatprep.subr.bf16.mxu0 %v1929_v9  ;;  %v1965_v5 = vpack.c.bf16 %v612_v4, %v611_v3  ;;  %v817_v4 = vld [vmem:[%s2870_s15 + $0x50] sm:$0xff] }
  0x55   :  { %1932 = vmatpush3.bf16.msra.mxu0 %v1929_v9  ;;  %v615_v9 = vld [vmem:[%s2912_s9 + $0x50] sm:$0xff] }
  0x56   :  { %1934 = vmatprep.subr.bf16.mxu0 %v1933_v12  ;;  %v1973_v11 = vpack.c.bf16 %v616_v10, %v615_v9  ;;  %v821_v10 = vld [vmem:[%s2870_s15 + $0x70] sm:$0xff] }
 0x10b   :  { %v1579_v14 = vpop.f32.mrb[0].mxu0 }
 0x10c   :  { %v184_v15 = vadd.f32 %v1579_v14, %v1369_v13  ;;  %v178_v16 = vpop.f32.mrb[1].mxu0 }
 0x10d   :  { %v179_v17 = vadd.f32 %v1369_v13, %v178_v16  ;;  %v618_v13 = vld [vmem:[%s2912_s9 + $0x68] sm:$0xff]  ;;  %v620_v16 = vld [vmem:[%s2912_s9 + $0x78] sm:$0xff] }
 0x10e   :  { %v190_v18 = vmul.f32 0.01, %v184_v15  ;;  %vm188_vm1 = vcmp.gt.f32.partialorder %v184_v15, 0.0 }
 0x10f   :  { %vm187_vm0 = vcmp.gt.f32.partialorder %v179_v17, 0.0  ;;  %v189_v21 = vmul.f32 0.01, %v179_v17 }
 0x110   :  { %v192_v24 = vsel %vm188_vm1, %v184_v15, %v190_v18  ;;  %v619_v15 = vld [vmem:[%s2912_s9 + $0x70] sm:$0xff] }
 0x111   :  { %v191_v22 = vsel %vm187_vm0, %v179_v17, %v189_v21  ;;  %v1981_v17 = vpack.c.bf16 %v620_v16, %v619_v15  ;;  %v709_v21 = vld [vmem:[%s2868_s13] sm:$0xff]  ;;  %v913_v16 = vld [vmem:[%s2872_s17 + $0x10] sm:$0xff]  ;;  %vm922_vm0 = vcmask 261120  }
 0x112   :  { %1612 = vmatprep.mubr.f32.mxu1 %v191_v22  ;;  %1647 = vmatprep.mubr.f32.mxu0 %v191_v22  ;;  %v710_v22 = vld [vmem:[%s2868_s13 + $0x8] sm:$0xff] }
 0x113   :  { %1613 = vmatmul.mubr.f32.vlgmr.msra.gmra.mrb[0].mxu1 %v192_v24  ;;  %1648 = vmatmul.mubr.f32.vlgmr.msra.gmra.mrb[2].mxu0 %v192_v24  ;;  %v1985_v24 = vpack.c.bf16 %v710_v22, %v709_v21  ;;  %v1379_v22 = vld [vmem:[%s2869_s14] ss:$0 sm:$0xff] }
 0x114   :  { %1936 = vmatpush3.bf16.msra.mxu0 %v1933_v12  ;;  %1952 = vmatpush3.bf16.msra.mxu1 %v1949_v44  ;;  %v617_v12 = vld [vmem:[%s2912_s9 + $0x60] sm:$0xff] }
 0x115   :  { %1938 = vmatprep.subr.bf16.mxu0 %v1937_v23  ;;  %1954 = vmatprep.subr.bf16.mxu1 %v1953_v47  ;;  %v1977_v14 = vpack.c.bf16 %v618_v13, %v617_v12  ;;  %v911_v13 = vld [vmem:[%s2872_s17] sm:$0xff] }
 0x118   :  { %1940 = vmatpush3.bf16.msra.mxu0 %v1937_v23  ;;  %v711_v23 = vld [vmem:[%s2868_s13 + $0x10] sm:$0xff] }
 0x119   :  { %1942 = vmatprep.subr.bf16.mxu0 %v1941_v27  ;;  %v1989_v26 = vpack.c.bf16 %v712_v25, %v711_v23 }
 0x11c   :  { %1944 = vmatpush3.bf16.msra.mxu0 %v1941_v27  ;;  %v713_v27 = vld [vmem:[%s2868_s13 + $0x20] sm:$0xff] }
 0x11d   :  { %1946 = vmatprep.subr.bf16.mxu0 %v1945_v30  ;;  %v1993_v29 = vpack.c.bf16 %v714_v28, %v713_v27  ;;  %v1382_v27 = vld [vmem:[%s2871_s16] ss:$0 sm:$0xff] }
 0x120   :  { %1948 = vmatpush3.bf16.msra.mxu0 %v1945_v30  ;;  %v715_v30 = vld [vmem:[%s2868_s13 + $0x30] sm:$0xff] }
 0x121   :  { %1986 = vmatprep.subr.bf16.mxu0 %v1985_v24 }
 0x1e6   :  { %v2524_v32 = vpop.f32.mrb[0].mxu1  ;;  %v1649_v33 = vpop.f32.mrb[2].mxu0 }
 0x1e7   :  { %v392_v34 = vadd.f32 %v1649_v33, %v1371_v31  ;;  %v282_v35 = vpop.f32.mrb[1].mxu1  ;;  %v386_v36 = vpop.f32.mrb[3].mxu0  ;;  %v288_v18 = vadd.f32 %v2524_v32, %v1370_v48  ;;  %v807_v33 = vld [vmem:[%s2870_s15] sm:$0xff] }
 0x1e8   :  { %v387_v37 = vadd.f32 %v1371_v31, %v386_v36  ;;  %v283_v50 = vadd.f32 %v1370_v48, %v282_v35  ;;  %v716_v31 = vld [vmem:[%s2868_s13 + $0x38] sm:$0xff]  ;;  %v1375_v36 = vld [vmem:[%s2915_s30] ss:$0 sm:$0xff] }
 0x1e9   :  { %v398_v38 = vmul.f32 0.01, %v392_v34  ;;  %vm396_vm2 = vcmp.gt.f32.partialorder %v392_v34, 0.0  ;;  %v294_v19 = vmul.f32 0.01, %v288_v18  ;;  %vm292_vm9 = vcmp.gt.f32.partialorder %v288_v18, 0.0 }
 0x1ea   :  { %vm395_vm3 = vcmp.gt.f32.partialorder %v387_v37, 0.0  ;;  %v397_v39 = vmul.f32 0.01, %v387_v37  ;;  %v293_v55 = vmul.f32 0.01, %v283_v50  ;;  %vm291_vm8 = vcmp.gt.f32.partialorder %v283_v50, 0.0 }
 0x1eb   :  { %v400_v41 = vsel %vm396_vm2, %v392_v34, %v398_v38  ;;  %v296_v20 = vsel %vm292_vm9, %v288_v18, %v294_v19  ;;  %v1997_v32 = vpack.c.bf16 %v716_v31, %v715_v30  ;;  %v808_v34 = vld [vmem:[%s2870_s15 + $0x8] sm:$0xff]  ;;  %v1010_v19 = vld [vmem:[%s2874_s19] sm:$0xff] }
 0x1ec   :  { %v399_v40 = vsel %vm395_vm3, %v387_v37, %v397_v39  ;;  %v2560_v1 = vsel %vm291_vm8, %v283_v50, %v293_v55  ;;  %v2001_v35 = vpack.c.bf16 %v808_v34, %v807_v33  ;;  %v1012_v33 = vld [vmem:[%s2874_s19 + $0x10] sm:$0xff]  ;;  %v1013_v34 = vld [vmem:[%s2874_s19 + $0x18] sm:$0xff] }
 0x1ed   :  { %1666 = vmatprep.mubr.msk.f32.mxu0 %vm416_vm4, %v399_v40 }
 0x1ee   :  { %1667 = vmatmul.mubr.msk.f32.vlgmr.msra.gmra.mrb[4].mxu0 %vm416_vm4, %v400_v41 }
 0x1ef   :  { %1988 = vmatpush3.bf16.msra.mxu0 %v1985_v24 }
 0x1f0   :  { %1990 = vmatprep.subr.bf16.mxu0 %v1989_v26 }
 0x1f3   :  { %1992 = vmatpush3.bf16.msra.mxu0 %v1989_v26 }
 0x1f4   :  { %1994 = vmatprep.subr.bf16.mxu0 %v1993_v29 }
 0x1f7   :  { %1996 = vmatpush3.bf16.msra.mxu0 %v1993_v29 }
 0x1f8   :  { %1998 = vmatprep.subr.bf16.mxu0 %v1997_v32 }
 0x1fb   :  { %2000 = vmatpush3.bf16.msra.mxu0 %v1997_v32 }
 0x1fc   :  { %2002 = vmatprep.subr.bf16.mxu0 %v2001_v35 }
 0x2c1   :  { %v1668_v51 = vpop.f32.mrb[4].mxu0 }
 0x2c2   :  { %v495_v52 = vadd.f32 %v1668_v51, %v1372_v49  ;;  %v489_v53 = vpop.f32.mrb[5].mxu0 }
 0x2c3   :  { %v490_v54 = vadd.f32 %v1372_v49, %v489_v53  ;;  %v809_v53 = vld [vmem:[%s2870_s15 + $0x10] sm:$0xff] }
 0x2c4   :  { %v501_v56 = vmul.f32 0.01, %v495_v52  ;;  %vm499_vm5 = vcmp.gt.f32.partialorder %v495_v52, 0.0 }
 0x2c5   :  { %vm498_vm6 = vcmp.gt.f32.partialorder %v490_v54, 0.0  ;;  %v500_v59 = vmul.f32 0.01, %v490_v54 }
 0x2c6   :  { %v503_v62 = vsel %vm499_vm5, %v495_v52, %v501_v56 }
 0x2c7   :  { %v502_v60 = vsel %vm498_vm6, %v490_v54, %v500_v59  ;;  %v810_v54 = vld [vmem:[%s2870_s15 + $0x18] sm:$0xff]  ;;  %v811_v59 = vld [vmem:[%s2870_s15 + $0x20] sm:$0xff] }
 0x2c8   :  { %1673 = vmatprep.mubr.msk.f32.mxu1 %vm513_vm7, %v502_v60  ;;  %v2005_v57 = vpack.c.bf16 %v810_v54, %v809_v53  ;;  %v812_v60 = vld [vmem:[%s2870_s15 + $0x28] sm:$0xff] }
 0x2c9   :  { %1674 = vmatmul.mubr.msk.f32.vlgmr.msra.gmra.mrb[2].mxu1 %vm513_vm7, %v503_v62  ;;  %v813_v62 = vld [vmem:[%s2870_s15 + $0x30] sm:$0xff] }
 0x2ca   :  { %1956 = vmatpush3.bf16.msra.mxu1 %v1953_v47  ;;  %1708 = vmatprep.mubr.f32.mxu1 %v2560_v1  ;;  %v1378_v47 = vld [vmem:[%s2916_s3] ss:$0 sm:$0xff]  ;;  %v2013_v0 = vpack.c.bf16 %v814_v63, %v813_v62  ;;  %v1113_v63 = vld [vmem:[%s2876_s21 + $0x28] sm:$0xff] }
 0x2cb   :  { %1958 = vmatprep.subr.bf16.mxu1 %v1957_v61  ;;  %v1112_v62 = vld [vmem:[%s2876_s21 + $0x20] sm:$0xff] }
 0x2ce   :  { %1960 = vmatpush3.bf16.msra.mxu1 %v1957_v61  ;;  %v2009_v61 = vpack.c.bf16 %v812_v60, %v811_v59 }
 0x2cf   :  { %1962 = vmatprep.subr.bf16.mxu1 %v1961_v2 }
 0x2d2   :  { %1964 = vmatpush3.bf16.msra.mxu1 %v1961_v2  ;;  %v816_v2 = vld [vmem:[%s2870_s15 + $0x48] sm:$0xff] }
 0x2d3   :  { %1966 = vmatprep.subr.bf16.mxu1 %v1965_v5 }
 0x2d6   :  { %1968 = vmatpush3.bf16.msra.mxu1 %v1965_v5  ;;  %v818_v5 = vld [vmem:[%s2870_s15 + $0x58] sm:$0xff] }
 0x2d7   :  { %1970 = vmatprep.subr.bf16.mxu1 %v1969_v8  ;;  %v2021_v6 = vpack.c.bf16 %v818_v5, %v817_v4  ;;  %v1116_v4 = vld [vmem:[%s2876_s21 + $0x40] sm:$0xff] }
 0x2da   :  { %1972 = vmatpush3.bf16.msra.mxu1 %v1969_v8  ;;  %v820_v8 = vld [vmem:[%s2870_s15 + $0x68] sm:$0xff] }
 0x2db   :  { %1974 = vmatprep.subr.bf16.mxu1 %v1973_v11  ;;  %v2025_v9 = vpack.c.bf16 %v820_v8, %v819_v7  ;;  %v1119_v7 = vld [vmem:[%s2876_s21 + $0x58] sm:$0xff] }
 0x2de   :  { %1976 = vmatpush3.bf16.msra.mxu1 %v1973_v11  ;;  %v822_v11 = vld [vmem:[%s2870_s15 + $0x78] sm:$0xff] }
 0x2df   :  { %1978 = vmatprep.subr.bf16.mxu1 %v1977_v14  ;;  %v2029_v12 = vpack.c.bf16 %v822_v11, %v821_v10  ;;  %v1121_v10 = vld [vmem:[%s2876_s21 + $0x68] sm:$0xff] }
 0x2e2   :  { %1980 = vmatpush3.bf16.msra.mxu1 %v1977_v14  ;;  %v912_v14 = vld [vmem:[%s2872_s17 + $0x8] sm:$0xff] }
 0x2e3   :  { %1982 = vmatprep.subr.bf16.mxu1 %v1981_v17  ;;  %v2033_v15 = vpack.c.bf16 %v912_v14, %v911_v13  ;;  %v1123_v13 = vld [vmem:[%s2876_s21 + $0x78] sm:$0xff] }
 0x2e6   :  { %1984 = vmatpush3.bf16.msra.mxu1 %v1981_v17  ;;  %v914_v17 = vld [vmem:[%s2872_s17 + $0x18] sm:$0xff] }
 0x2e7   :  { %2034 = vmatprep.subr.bf16.mxu1 %v2033_v15  ;;  %v2037_v18 = vpack.c.bf16 %v914_v17, %v913_v16  ;;  %v1213_v16 = vld [vmem:[%s2878_s23 + $0x8] sm:$0xff] }
 0x2e9   :  { %1709 = vmatmul.mubr.f32.vlgmr.msra.gmra.mrb[4].mxu1 %v296_v20 }
 0x2ea   :  { %2036 = vmatpush3.bf16.msra.mxu1 %v2033_v15  ;;  %v1212_v15 = vld [vmem:[%s2878_s23] sm:$0xff] }
 0x2eb   :  { %2038 = vmatprep.subr.bf16.mxu1 %v2037_v18  ;;  %v2089_v17 = vpack.c.bf16 %v1213_v16, %v1212_v15 }
 0x2ee   :  { %2040 = vmatpush3.bf16.msra.mxu1 %v2037_v18  ;;  %v1386_v18 = vld [vmem:[%s2875_s20] ss:$0 sm:$0xff]  ;;  %s2193_s20 = smov [#allocation4]  }
 0x2ef   :  { %s1323_s23 = sshll.u32 %s2193_s20, 4  ;;  %s1324_s23 = int_to_ptr.vmem [resolvable:$true] %s1323_s23 }
 0x2f0   :  { %p2104_p1 = scmp.lt.s32.totalorder %s1324_s23, %s1324_s23 }
 0x39c   :  { %v1675_v37 = vpop.f32.mrb[2].mxu1 }
 0x39d   :  { %v592_v38 = vadd.f32 %v1675_v37, %v1375_v36  ;;  %v586_v39 = vpop.f32.mrb[3].mxu1  ;;  %v2045_v37 = vpack.c.bf16 %v1013_v34, %v1012_v33 }
 0x39e   :  { %v587_v40 = vadd.f32 %v1375_v36, %v586_v39  ;;  %v1014_v39 = vld [vmem:[%s2874_s19 + $0x20] sm:$0xff] }
 0x39f   :  { %vm596_vm10 = vcmp.gt.f32.partialorder %v592_v38, 0.0  ;;  %v598_v41 = vmul.f32 0.01, %v592_v38 }
 0x3a0   :  { %v597_v42 = vmul.f32 0.01, %v587_v40  ;;  %vm595_vm11 = vcmp.gt.f32.partialorder %v587_v40, 0.0 }
 0x3a1   :  { %v600_v43 = vsel %vm596_vm10, %v592_v38, %v598_v41 }
 0x3a2   :  { %v599_v44 = vsel %vm595_vm11, %v587_v40, %v597_v42  ;;  %v2627_v45 = vadd.f32 %v600_v43, %v296_v20  ;;  %v1011_v20 = vld [vmem:[%s2874_s19 + $0x8] sm:$0xff]  ;;  %v1016_v42 = vld [vmem:[%s2874_s19 + $0x30] sm:$0xff] }
 0x3a3   :  { %v2630_v46 = vadd.f32 %v599_v44, %v2560_v1  ;;  %v815_v1 = vld [vmem:[%s2870_s15 + $0x40] sm:$0xff]  ;;  %v2041_v21 = vpack.c.bf16 %v1011_v20, %v1010_v19  ;;  %v1015_v40 = vld [vmem:[%s2874_s19 + $0x28] sm:$0xff]  ;;  %s2194_s15 = smov [#allocation2]  }
 0x3a4   :  { %604 = vst [vmem:[#allocation2 + $0x8] sm:$0xff] %v2627_v45  ;;  %v2017_v3 = vpack.c.bf16 %v816_v2, %v815_v1  ;;  %v2049_v41 = vpack.c.bf16 %v1015_v40, %v1014_v39  ;;  %v1114_v1 = vld [vmem:[%s2876_s21 + $0x30] sm:$0xff]  ;;  %v1115_v2 = vld [vmem:[%s2876_s21 + $0x38] sm:$0xff]  ;;  %s1311_s10 = sshll.u32 %s2194_s15, 4  ;;  %s1312_s10 = int_to_ptr.vmem [resolvable:$true] %s1311_s10 }
 0x3a5   :  { %603 = vst [vmem:[#allocation2] sm:$0xff] %v2630_v46  ;;  %2042 = vmatprep.subr.bf16.mxu1 %v2041_v21 }
 0x3bc   :  { %v1710_v48 = vpop.f32.mrb[4].mxu1 }
 0x3bd   :  { %v700_v49 = vadd.f32 %v1710_v48, %v1378_v47  ;;  %v694_v50 = vpop.f32.mrb[5].mxu1  ;;  %v1109_v48 = vld [vmem:[%s2876_s21 + $0x8] sm:$0xff] }
 0x3be   :  { %v695_v51 = vadd.f32 %v1378_v47, %v694_v50  ;;  %v1108_v47 = vld [vmem:[%s2876_s21] sm:$0xff] }
 0x3bf   :  { %v706_v52 = vmul.f32 0.01, %v700_v49  ;;  %vm704_vm12 = vcmp.gt.f32.partialorder %v700_v49, 0.0  ;;  %v1383_v50 = vld [vmem:[%s2873_s18] ss:$0 sm:$0xff] }
 0x3c0   :  { %vm703_vm13 = vcmp.gt.f32.partialorder %v695_v51, 0.0  ;;  %v705_v55 = vmul.f32 0.01, %v695_v51 }
 0x3c1   :  { %v708_v58 = vsel %vm704_vm12, %v700_v49, %v706_v52  ;;  %v2057_v49 = vpack.c.bf16 %v1109_v48, %v1108_v47 }
 0x3c2   :  { %v707_v56 = vsel %vm703_vm13, %v695_v51, %v705_v55 }
 0x3c3   :  { %1727 = vmatprep.mubr.msk.f32.mxu0 %vm416_vm4, %v707_v56  ;;  %v1110_v56 = vld [vmem:[%s2876_s21 + $0x10] sm:$0xff] }
 0x3c4   :  { %1728 = vmatmul.mubr.msk.f32.vlgmr.msra.gmra.mrb[6].mxu0 %vm416_vm4, %v708_v58 }
 0x3c5   :  { %2004 = vmatpush3.bf16.msra.mxu0 %v2001_v35  ;;  %1762 = vmatprep.mubr.f32.mxu0 %v599_v44 }
 0x3c6   :  { %2006 = vmatprep.subr.bf16.mxu0 %v2005_v57 }
 0x3c9   :  { %2008 = vmatpush3.bf16.msra.mxu0 %v2005_v57  ;;  %v1111_v57 = vld [vmem:[%s2876_s21 + $0x18] sm:$0xff] }
 0x3ca   :  { %2010 = vmatprep.subr.bf16.mxu0 %v2009_v61  ;;  %v2061_v60 = vpack.c.bf16 %v1111_v57, %v1110_v56 }
 0x3cd   :  { %2012 = vmatpush3.bf16.msra.mxu0 %v2009_v61 }
 0x3ce   :  { %2014 = vmatprep.subr.bf16.mxu0 %v2013_v0 }
 0x3d1   :  { %2016 = vmatpush3.bf16.msra.mxu0 %v2013_v0  ;;  %v2065_v0 = vpack.c.bf16 %v1113_v63, %v1112_v62 }
 0x3d2   :  { %2018 = vmatprep.subr.bf16.mxu0 %v2017_v3 }
 0x3d5   :  { %2020 = vmatpush3.bf16.msra.mxu0 %v2017_v3  ;;  %v2069_v3 = vpack.c.bf16 %v1115_v2, %v1114_v1 }
 0x3d6   :  { %2022 = vmatprep.subr.bf16.mxu0 %v2021_v6 }
 0x3d9   :  { %2024 = vmatpush3.bf16.msra.mxu0 %v2021_v6  ;;  %v1118_v6 = vld [vmem:[%s2876_s21 + $0x50] sm:$0xff] }
 0x3da   :  { %2026 = vmatprep.subr.bf16.mxu0 %v2025_v9  ;;  %v2077_v8 = vpack.c.bf16 %v1119_v7, %v1118_v6 }
 0x3dd   :  { %2028 = vmatpush3.bf16.msra.mxu0 %v2025_v9  ;;  %v1120_v9 = vld [vmem:[%s2876_s21 + $0x60] sm:$0xff] }
 0x3de   :  { %2030 = vmatprep.subr.bf16.mxu0 %v2029_v12  ;;  %v2081_v11 = vpack.c.bf16 %v1121_v10, %v1120_v9 }
 0x3e1   :  { %2032 = vmatpush3.bf16.msra.mxu0 %v2029_v12  ;;  %v1122_v12 = vld [vmem:[%s2876_s21 + $0x70] sm:$0xff] }
 0x3e2   :  { %v2085_v14 = vpack.c.bf16 %v1123_v13, %v1122_v12 }
 0x3e4   :  { %1763 = vmatmul.mubr.f32.vlgmr.msra.gmra.mrb[8].mxu0 %v600_v43  ;;  %v1017_v43 = vld [vmem:[%s2874_s19 + $0x38] sm:$0xff] }
 0x3e5   :  { %v2053_v44 = vpack.c.bf16 %v1017_v43, %v1016_v42 }
 0x497   :  { %v1729_v23 = vpop.f32.mrb[6].mxu0 }
 0x498   :  { %v802_v24 = vadd.f32 %v1729_v23, %v1379_v22  ;;  %v796_v25 = vpop.f32.mrb[7].mxu0 }
 0x499   :  { %v797_v26 = vadd.f32 %v1379_v22, %v796_v25 }
 0x49a   :  { %806 = vst [vmem:[#allocation4 + $0x8] sm:$0xff] %v802_v24 }
 0x49b   :  { %805 = vst [vmem:[#allocation4] sm:$0xff] %v797_v26 }
 0x4b7   :  { %v1764_v28 = vpop.f32.mrb[8].mxu0 }
 0x4b8   :  { %v902_v29 = vadd.f32 %v1764_v28, %v1382_v27  ;;  %v896_v30 = vpop.f32.mrb[9].mxu0 }
 0x4b9   :  { %v897_v31 = vadd.f32 %v1382_v27, %v896_v30 }
 0x4ba   :  { %v908_v32 = vmul.f32 0.01, %v902_v29  ;;  %vm906_vm14 = vcmp.gt.f32.partialorder %v902_v29, 0.0 }
 0x4bb   :  { %vm905_vm15 = vcmp.gt.f32.partialorder %v897_v31, 0.0  ;;  %v907_v35 = vmul.f32 0.01, %v897_v31 }
 0x4bc   :  { %v910_v38 = vsel %vm906_vm14, %v902_v29, %v908_v32 }
 0x4bd   :  { %v909_v36 = vsel %vm905_vm15, %v897_v31, %v907_v35 }
 0x4be   :  { %1773 = vmatprep.mubr.msk.f32.mxu1 %vm922_vm0, %v909_v36 }
 0x4bf   :  { %1774 = vmatmul.mubr.msk.f32.vlgmr.msra.gmra.mrb[6].mxu1 %vm922_vm0, %v910_v38 }
 0x4c0   :  { %2044 = vmatpush3.bf16.msra.mxu1 %v2041_v21 }
 0x4c1   :  { %2046 = vmatprep.subr.bf16.mxu1 %v2045_v37 }
 0x4c4   :  { %2048 = vmatpush3.bf16.msra.mxu1 %v2045_v37 }
 0x4c5   :  { %2050 = vmatprep.subr.bf16.mxu1 %v2049_v41 }
 0x4c8   :  { %2052 = vmatpush3.bf16.msra.mxu1 %v2049_v41 }
 0x4c9   :  { %2054 = vmatprep.subr.bf16.mxu1 %v2053_v44 }
 0x4cc   :  { %2056 = vmatpush3.bf16.msra.mxu1 %v2053_v44 }
 0x4cd   :  { %2058 = vmatprep.subr.bf16.mxu1 %v2057_v49 }
 0x592   :  { %v1775_v51 = vpop.f32.mrb[6].mxu1 }
 0x593   :  { %v1001_v52 = vadd.f32 %v1775_v51, %v1383_v50  ;;  %v995_v53 = vpop.f32.mrb[7].mxu1 }
 0x594   :  { %v996_v54 = vadd.f32 %v1383_v50, %v995_v53 }
 0x595   :  { %v1007_v55 = vmul.f32 0.01, %v1001_v52  ;;  %vm1005_vm1 = vcmp.gt.f32.partialorder %v1001_v52, 0.0 }
 0x596   :  { %vm1004_vm2 = vcmp.gt.f32.partialorder %v996_v54, 0.0  ;;  %v1006_v58 = vmul.f32 0.01, %v996_v54 }
 0x597   :  { %v1009_v61 = vsel %vm1005_vm1, %v1001_v52, %v1007_v55 }
 0x598   :  { %v1008_v59 = vsel %vm1004_vm2, %v996_v54, %v1006_v58 }
 0x599   :  { %1792 = vmatprep.mubr.msk.f32.mxu1 %vm416_vm4, %v1008_v59 }
 0x59a   :  { %1793 = vmatmul.mubr.msk.f32.vlgmr.msra.gmra.mrb[8].mxu1 %vm416_vm4, %v1009_v61 }
 0x59b   :  { %2060 = vmatpush3.bf16.msra.mxu1 %v2057_v49  ;;  %1827 = vmatprep.mubr.f32.mxu1 %v2630_v46  ;;  %v1117_v46 = vld [vmem:[%s2876_s21 + $0x48] sm:$0xff] }
 0x59c   :  { %2062 = vmatprep.subr.bf16.mxu1 %v2061_v60  ;;  %v2073_v5 = vpack.c.bf16 %v1117_v46, %v1116_v4 }
 0x59f   :  { %2064 = vmatpush3.bf16.msra.mxu1 %v2061_v60 }
 0x5a0   :  { %2066 = vmatprep.subr.bf16.mxu1 %v2065_v0 }
 0x5a3   :  { %2068 = vmatpush3.bf16.msra.mxu1 %v2065_v0 }
 0x5a4   :  { %2070 = vmatprep.subr.bf16.mxu1 %v2069_v3 }
 0x5a7   :  { %2072 = vmatpush3.bf16.msra.mxu1 %v2069_v3 }
 0x5a8   :  { %2074 = vmatprep.subr.bf16.mxu1 %v2073_v5 }
 0x5ab   :  { %2076 = vmatpush3.bf16.msra.mxu1 %v2073_v5 }
 0x5ac   :  { %2078 = vmatprep.subr.bf16.mxu1 %v2077_v8 }
 0x5af   :  { %2080 = vmatpush3.bf16.msra.mxu1 %v2077_v8 }
 0x5b0   :  { %2082 = vmatprep.subr.bf16.mxu1 %v2081_v11 }
 0x5b3   :  { %2084 = vmatpush3.bf16.msra.mxu1 %v2081_v11 }
 0x5b4   :  { %2086 = vmatprep.subr.bf16.mxu1 %v2085_v14 }
 0x5b7   :  { %2088 = vmatpush3.bf16.msra.mxu1 %v2085_v14 }
 0x5b8   :  { %2090 = vmatprep.subr.bf16.mxu1 %v2089_v17 }
 0x5ba   :  { %1828 = vmatmul.mubr.f32.vlgmr.msra.gmra.mrb[10].mxu1 %v2627_v45  ;;  %v1389_v45 = vld [vmem:[%s2877_s22] ss:$0 sm:$0xff]  ;;  %s2099_s22 = scalar_lea.vmem %s1324_s23, 256 }
 0x5bb   :  { %2092 = vmatpush3.bf16.msra.mxu1 %v2089_v17  ;;  %p2100_p0 = scmp.ne.s32.totalorder %s1324_s23, %s2099_s22  ;;  %p2105_p2 = scmp.lt.s32.totalorder %s2099_s22, %s2099_s22 }
 0x5bd   :  { %p2106_p3 = por %p2105_p2, %p2104_p1 }
 0x5bf   :  { %p2107_p4 = pnand %p2106_p3, %p2100_p0 }
 0x66d   :  { %v1794_v19 = vpop.f32.mrb[8].mxu1 }
 0x66e   :  { %v1103_v20 = vadd.f32 %v1794_v19, %v1386_v18  ;;  %v1097_v21 = vpop.f32.mrb[9].mxu1 }
 0x66f   :  { %v1098_v22 = vadd.f32 %v1386_v18, %v1097_v21 }
 0x670   :  { %1107 = vst [vmem:[#allocation6 + $0x8] sm:$0xff] %v1103_v20 }
 0x671   :  { %1106 = vst [vmem:[#allocation6] sm:$0xff] %v1098_v22 }
 0x68d   :  { %v1829_v23 = vpop.f32.mrb[10].mxu1 }
 0x68e   :  { %v1203_v24 = vadd.f32 %v1829_v23, %v1389_v45  ;;  %v1197_v25 = vpop.f32.mrb[11].mxu1 }
 0x68f   :  { %v1198_v26 = vadd.f32 %v1389_v45, %v1197_v25 }
 0x690   :  { %v1209_v27 = vmul.f32 0.01, %v1203_v24  ;;  %vm1207_vm3 = vcmp.gt.f32.partialorder %v1203_v24, 0.0 }
 0x691   :  { %vm1206_vm4 = vcmp.gt.f32.partialorder %v1198_v26, 0.0  ;;  %v1208_v28 = vmul.f32 0.01, %v1198_v26 }
 0x692   :  { %v1211_v30 = vsel %vm1207_vm3, %v1203_v24, %v1209_v27 }
 0x693   :  { %v1210_v29 = vsel %vm1206_vm4, %v1198_v26, %v1208_v28 }
 0x694   :  { %1834 = vmatprep.mubr.msk.f32.mxu1 %vm513_vm7, %v1210_v29 }
 0x695   :  { %1835 = vmatmul.mubr.msk.f32.vlgmr.msra.gmra.mrb[12].mxu1 %vm513_vm7, %v1211_v30 }
 0x696   :  { %2110 = shalt.err (!%p2107_p4)
}
 0x697   :  { %s2111_s5 = scalar_lea.hbm %s2881_s26, 256 }
 0x698   :  { %p2112_p5 = scmp.ne.s32.totalorder %s2881_s26, %s2111_s5  ;;  %p2115_p6 = scmp.lt.u32.totalorder %s2111_s5, %s2881_s26 }
 0x69a   :  { %p2117_p7 = pnand %p2115_p6, %p2112_p5 }
 0x69c   :  { %2120 = shalt.err (!%p2117_p7)
}
 0x69d   :  { %s2195_s19 = smov 128   ;;  %s2196_s17 = smov 8  }
 0x69e   :  { %1329 = dma.vmem_to_hbm [thread:$0]  %s1324_s23, 256, %s2881_s26, [#allocation5], %s2195_s19, %s2195_s19, %s2196_s17  }
 0x69f   :  { %s2121_s18 = scalar_lea.vmem %s1312_s10, 256  ;;  %p2126_p9 = scmp.lt.s32.totalorder %s1312_s10, %s1312_s10 }
 0x6a0   :  { %p2122_p8 = scmp.ne.s32.totalorder %s1312_s10, %s2121_s18  ;;  %p2127_p10 = scmp.lt.s32.totalorder %s2121_s18, %s2121_s18 }
 0x6a2   :  { %p2128_p11 = por %p2127_p10, %p2126_p9 }
 0x6a4   :  { %p2129_p12 = pnand %p2128_p11, %p2122_p8 }
 0x6a6   :  { %2132 = shalt.err (!%p2129_p12)
}
 0x6a7   :  { %s2133_s30 = scalar_lea.hbm %s2880_s25, 256 }
 0x6a8   :  { %p2134_p13 = scmp.ne.s32.totalorder %s2880_s25, %s2133_s30  ;;  %p2137_p0 = scmp.lt.u32.totalorder %s2133_s30, %s2880_s25 }
 0x6aa   :  { %p2139_p1 = pnand %p2137_p0, %p2134_p13 }
 0x6ac   :  { %2142 = shalt.err (!%p2139_p1)
}
 0x6ad   :  { %1317 = dma.vmem_to_hbm [thread:$0]  %s1312_s10, 256, %s2880_s25, [#allocation3], %s2195_s19, %s2195_s19, %s2196_s17  }
 0x6ae   :  { %s2197_s6 = smov [#allocation6]  }
 0x6af   :  { %s1335_s20 = sshll.u32 %s2197_s6, 4  ;;  %s1336_s20 = int_to_ptr.vmem [resolvable:$true] %s1335_s20 }
 0x6b0   :  { %s2143_s23 = scalar_lea.vmem %s1336_s20, 256  ;;  %p2148_p3 = scmp.lt.s32.totalorder %s1336_s20, %s1336_s20 }
 0x6b1   :  { %p2144_p2 = scmp.ne.s32.totalorder %s1336_s20, %s2143_s23  ;;  %p2149_p4 = scmp.lt.s32.totalorder %s2143_s23, %s2143_s23 }
 0x6b3   :  { %p2150_p5 = por %p2149_p4, %p2148_p3 }
 0x6b5   :  { %p2151_p6 = pnand %p2150_p5, %p2144_p2 }
 0x6b7   :  { %2154 = shalt.err (!%p2151_p6)
}
 0x6b8   :  { %s2155_s0 = scalar_lea.hbm %s2882_s27, 256 }
 0x6b9   :  { %p2156_p7 = scmp.ne.s32.totalorder %s2882_s27, %s2155_s0  ;;  %p2159_p8 = scmp.lt.u32.totalorder %s2155_s0, %s2882_s27 }
 0x6bb   :  { %p2161_p9 = pnand %p2159_p8, %p2156_p7 }
 0x6bd   :  { %2164 = shalt.err (!%p2161_p9)
}
 0x6be   :  { %1341 = dma.vmem_to_hbm [thread:$0]  %s1336_s20, 256, %s2882_s27, [#allocation5], %s2195_s19, %s2195_s19, %s2196_s17  }
 0x6bf   :  { %v1390_v31 = vld [vmem:[%s2879_s24] ss:$0 sm:$0xff]  ;;  %s2198_s9 = smov [#allocation7]  }
 0x6c0   :  { %s1347_s4 = sshll.u32 %s2198_s9, 4  ;;  %s1348_s4 = int_to_ptr.vmem [resolvable:$true] %s1347_s4 }
 0x6c1   :  { %s2165_s18 = scalar_lea.vmem %s1348_s4, 256  ;;  %p2170_p11 = scmp.lt.s32.totalorder %s1348_s4, %s1348_s4 }
 0x6c2   :  { %p2166_p10 = scmp.ne.s32.totalorder %s1348_s4, %s2165_s18  ;;  %p2171_p12 = scmp.lt.s32.totalorder %s2165_s18, %s2165_s18 }
 0x6c4   :  { %p2172_p13 = por %p2171_p12, %p2170_p11 }
 0x6c6   :  { %p2173_p0 = pnand %p2172_p13, %p2166_p10 }
 0x768   :  { %v1836_v32 = vpop.f32.mrb[12].mxu1 }
 0x769   :  { %v1299_v33 = vadd.f32 %v1836_v32, %v1390_v31  ;;  %v1293_v34 = vpop.f32.mrb[13].mxu1 }
 0x76a   :  { %v1294_v35 = vadd.f32 %v1390_v31, %v1293_v34 }
 0x76b   :  { %v1303_v36 = vmax.f32 %v1299_v33, 0.0 }
 0x76c   :  { %v1302_v37 = vmax.f32 %v1294_v35, 0.0 }
 0x76d   :  { %1305 = vst [vmem:[#allocation7 + $0x8] sm:$0xff] %v1303_v36 }
 0x76e   :  { %1304 = vst [vmem:[#allocation7] sm:$0xff] %v1302_v37 }
 0x76f   :  { %2176 = shalt.err (!%p2173_p0)
}
 0x770   :  { %s2177_s8 = scalar_lea.hbm %s2883_s28, 256 }
 0x771   :  { %p2178_p1 = scmp.ne.s32.totalorder %s2883_s28, %s2177_s8  ;;  %p2181_p2 = scmp.lt.u32.totalorder %s2177_s8, %s2883_s28 }
 0x773   :  { %p2183_p3 = pnand %p2181_p2, %p2178_p1 }
 0x775   :  { %2186 = shalt.err (!%p2183_p3)
}
 0x776   :  { %1353 = dma.vmem_to_hbm [thread:$0]  %s1348_s4, 256, %s2883_s28, [#allocation8], %s2195_s19, %s2195_s19, %s2196_s17  }
 0x777   :  { %2187 = dma.done.wait [#allocation3], 256  }
 0x778   :  { %2188 = vsyncadd [#allocation3], 4294967040 }
 0x779   :  { %2189 = dma.done.wait [#allocation5], 512  }
 0x77a   :  { %2190 = vsyncadd [#allocation5], 4294966784 }
 0x77b   :  { %2191 = dma.done.wait [#allocation8], 256  }
 0x77c   :  { %2192 = vsyncadd [#allocation8], 4294967040 }
 0x77d   :  { %1366 = vsyncpa [#allocation3], 1 }
 0x77e   :  { %1367 = vsyncpa [#allocation5], 1 }
 0x77f   :  { %1368 = vsyncpa [#allocation8], 1 }

</bundles_post_ra>
